<compile_context>
chip_gen: v7x
topology: tpu7x:2x2x1
jax: 0.10.0
libtpu: 0.0.40
codegen_flags: <defaults>
</compile_context>

<pallas_src>
import functools

import jax
import jax.numpy as jnp
from jax.experimental import pallas as pl
from jax.experimental.pallas import tpu as pltpu


_VMEM_LIMIT = 32 * 1024 * 1024  # safe on v5e/v6e/v7x; >= every default scoped limit


# ----------------------------------------------------------------------------
# tiling helper
# ----------------------------------------------------------------------------

def _pick_tile(M):
    """Tile for the lane (M) axis.  Full-extent block when M < 128 (no padding,
    no wasted-lane pad copies); otherwise the largest of 512/256/128 that tiles
    M, padding M up to a multiple of 128 if needed.  Returns (tile, padded_M)."""
    if M < 128:
        return M, M
    for t in (512, 256, 128):
        if M % t == 0:
            return t, M
    Mp = ((M + 127) // 128) * 128
    return 128, Mp


# ----------------------------------------------------------------------------
# fused GEMM kernel:  o = act(W @ cols + b)   [+ per-channel sum / sum-sq]
# ----------------------------------------------------------------------------

def _gemm_bias_act_kernel(w_ref, x_ref, b_ref, o_ref, *stat_refs,
                          act, neg_slope, m_valid, tn, need_mask, n_grid):
    acc = jnp.dot(w_ref[...], x_ref[...], preferred_element_type=jnp.float32)
    acc = acc + b_ref[...]
    if act == "leaky_relu":
        acc = jnp.where(acc > 0, acc, neg_slope * acc)
    elif act == "sigmoid":
        acc = jax.nn.sigmoid(acc)
    elif act == "tanh":
        acc = jnp.tanh(acc)
    o_ref[...] = acc.astype(o_ref.dtype)

    if stat_refs:                        # fused BatchNorm statistics (review #1a)
        sum_ref, sq_ref = stat_refs
        first = pl.program_id(0) == 0
        for ax in range(1, n_grid):
            first = jnp.logical_and(first, pl.program_id(ax) == 0)

        @pl.when(first)
        def _():
            sum_ref[...] = jnp.zeros_like(sum_ref)
            sq_ref[...] = jnp.zeros_like(sq_ref)

        a = acc
        if need_mask:                    # ignore M-padding columns in the stats
            col = (jax.lax.broadcasted_iota(jnp.int32, acc.shape, 1)
                   + pl.program_id(n_grid - 1) * tn)
            a = jnp.where(col < m_valid, acc, 0.0)
        sum_ref[...] += jnp.sum(a, axis=1, keepdims=True)
        sq_ref[...] += jnp.sum(a * a, axis=1, keepdims=True)


def pallas_conv_gemm(w, cols, bias, act="none", neg_slope=0.01, with_stats=False):
    """Fused conv GEMM.

    w:    (Cout, K)       or (P, Cout, K)   weights (P = phase groups)
    cols: (K, M)          or (P, K, M)      im2col data (lane axis = M)
    Returns (out, sum, sq) where out is (Cout, M) / (P, Cout, M) f32 and
    sum/sq are (Cout, 1) per-channel BN statistics of the post-act output
    (None when with_stats=False)."""
    grouped = cols.ndim == 3
    if grouped:
        P, Cout, K = w.shape
        M = cols.shape[2]
    else:
        Cout, K = w.shape
        M = cols.shape[1]
    tn, Mp = _pick_tile(M)
    if Mp != M:
        pad_w = ((0, 0), (0, 0), (0, Mp - M)) if grouped else ((0, 0), (0, Mp - M))
        cols = jnp.pad(cols, pad_w)

    n_grid = 2 if grouped else 1
    kernel = functools.partial(
        _gemm_bias_act_kernel, act=act, neg_slope=neg_slope,
        m_valid=M, tn=tn, need_mask=(Mp != M) and with_stats, n_grid=n_grid)

    if grouped:
        grid = (P, Mp // tn)
        w_spec = pl.BlockSpec((None, Cout, K), lambda p, i: (p, 0, 0))
        x_spec = pl.BlockSpec((None, K, tn), lambda p, i: (p, 0, i))
        b_spec = pl.BlockSpec((Cout, 1), lambda p, i: (0, 0))
        o_spec = pl.BlockSpec((None, Cout, tn), lambda p, i: (p, 0, i))
        s_spec = pl.BlockSpec((Cout, 1), lambda p, i: (0, 0))
        out0 = jax.ShapeDtypeStruct((P, Cout, Mp), jnp.float32)
    else:
        grid = (Mp // tn,)
        w_spec = pl.BlockSpec((Cout, K), lambda i: (0, 0))
        x_spec = pl.BlockSpec((K, tn), lambda i: (0, i))
        b_spec = pl.BlockSpec((Cout, 1), lambda i: (0, 0))
        o_spec = pl.BlockSpec((Cout, tn), lambda i: (0, i))
        s_spec = pl.BlockSpec((Cout, 1), lambda i: (0, 0))
        out0 = jax.ShapeDtypeStruct((Cout, Mp), jnp.float32)

    if with_stats:
        out_shape = (out0,
                     jax.ShapeDtypeStruct((Cout, 1), jnp.float32),
                     jax.ShapeDtypeStruct((Cout, 1), jnp.float32))
        out_specs = (o_spec, s_spec, s_spec)
        sems = ("arbitrary",) * n_grid        # accumulator outputs
    else:
        out_shape = out0
        out_specs = o_spec
        sems = ("parallel",) * n_grid

    res = pl.pallas_call(
        kernel,
        out_shape=out_shape,
        grid=grid,
        in_specs=[w_spec, x_spec, b_spec],
        out_specs=out_specs,
        compiler_params=pltpu.CompilerParams(dimension_semantics=sems,
                                             vmem_limit_bytes=_VMEM_LIMIT),
    )(w.astype(jnp.bfloat16), cols.astype(jnp.bfloat16),
      bias.reshape(Cout, 1).astype(jnp.float32))

    if with_stats:
        out, ssum, ssq = res
    else:
        out, ssum, ssq = res, None, None
    if Mp != M:
        out = out[..., :M]
    return out, ssum, ssq


# ----------------------------------------------------------------------------
# BatchNorm fold helper (training-mode batch statistics, biased variance)
# ----------------------------------------------------------------------------

def _bn_scale_shift(stats, count, gamma, beta, eps=1e-5):
    s, sq = stats
    mean = s[:, 0] / count
    var = sq[:, 0] / count - mean * mean
    scale = gamma.astype(jnp.float32) * jax.lax.rsqrt(var + eps)
    shift = beta.astype(jnp.float32) - mean * scale
    return scale, shift


# ----------------------------------------------------------------------------
# Conv3d: channel-first im2col glue + fused Pallas GEMM
# ----------------------------------------------------------------------------

def _im2col_cf(x, ksizes, strides, pads):
    """x: (C, N, D, H, W) -> bf16 cols (C*kd*kh*kw, N*OD*OH*OW) + (OD, OH, OW).
    Row ordering is (cin, kd, kh, kw), matching w.reshape(Cout, -1)."""
    C, N, D, H, W = x.shape
    kd, kh, kw = ksizes
    sd, sh, sw = strides
    xp = jnp.pad(x.astype(jnp.bfloat16),
                 ((0, 0), (0, 0), pads[0], pads[1], pads[2]))
    Dp, Hp, Wp = xp.shape[2], xp.shape[3], xp.shape[4]
    OD = (Dp - kd) // sd + 1
    OH = (Hp - kh) // sh + 1
    OW = (Wp - kw) // sw + 1
    slabs = []
    for a in range(kd):
        for b in range(kh):
            for c in range(kw):
                slabs.append(xp[:, :,
                                a:a + sd * OD:sd,
                                b:b + sh * OH:sh,
                                c:c + sw * OW:sw])
    cols = jnp.stack(slabs, axis=1)                          # (C, K^3, N, OD, OH, OW)
    cols = cols.reshape(C * kd * kh * kw, N * OD * OH * OW)
    return cols, (OD, OH, OW)


def conv3d_cf(x, w, b, stride, pads, act="leaky_relu", neg_slope=0.01,
              bn_scale=None, bn_shift=None, with_stats=False):
    """x: (Cin, N, D, H, W); w: (Cout, Cin, kd, kh, kw).
    Optionally folds a preceding BatchNorm apply (scale/shift, applied BEFORE
    the zero padding -> exact at boundaries).  Returns ((Cout, N, OD, OH, OW),
    (sum, sq) BN statistics of the post-activation output or None)."""
    Cout, Cin = w.shape[0], w.shape[1]
    if bn_scale is not None:
        x = x * bn_scale.reshape(Cin, 1, 1, 1, 1) + bn_shift.reshape(Cin, 1, 1, 1, 1)
    cols, (OD, OH, OW) = _im2col_cf(x, (w.shape[2], w.shape[3], w.shape[4]),
                                    (stride,) * 3, pads)
    out, ssum, ssq = pallas_conv_gemm(w.reshape(Cout, -1), cols, b,
                                      act=act, neg_slope=neg_slope,
                                      with_stats=with_stats)
    out = out.reshape(Cout, x.shape[1], OD, OH, OW)
    return out, ((ssum, ssq) if with_stats else None)


# ----------------------------------------------------------------------------
# ConvTranspose3d: sub-pixel phase decomposition, ONE grouped pallas_call
# ----------------------------------------------------------------------------

def _deconv_phase_params_1d(D, k, s, p, op):
    """Per-output-phase parameters of the sub-pixel ConvTranspose decomposition."""
    O = (D - 1) * s - 2 * p + k + op
    phases = []
    for r in range(s):
        Q = (O - r + s - 1) // s                 # outputs in this phase
        par = (r + p) % s                        # tap parity contributing to phase r
        n = (k - par + s - 1) // s               # number of such taps
        c = (r + p - par) // s
        base = c - n + 1                         # raw input offset of leftmost tap
        padL = max(0, -base)
        padR = max(0, base + Q + n - 2 - (D - 1))
        off = base + padL                        # start in the padded input
        taps = [s * (n - 1 - j) + par for j in range(n)]  # flipped sub-kernel taps
        phases.append(dict(Q=Q, n=n, padL=padL, padR=padR, off=off, taps=taps))
    return phases, O


def conv_transpose3d_cf(x, w, b, stride, padding, output_padding,
                        act="leaky_relu", neg_slope=0.01,
                        bn_scale=None, bn_shift=None, with_stats=False):
    """x: (Cin, N, D, H, W); w: (Cin, Cout, K, K, K) (ConvTranspose3d layout).
    All stride^3 phase GEMMs run in one pallas_call; phase outputs are
    interleaved with a single reshape/transpose."""
    Cin, N, D, H, W = x.shape
    Cout = w.shape[1]
    k = w.shape[2]
    s = stride
    if bn_scale is not None:    # fold preceding BN apply (before zero padding -> exact)
        x = x * bn_scale.reshape(Cin, 1, 1, 1, 1) + bn_shift.reshape(Cin, 1, 1, 1, 1)

    ph_d, OD = _deconv_phase_params_1d(D, k, s, padding, output_padding)
    ph_h, OH = _deconv_phase_params_1d(H, k, s, padding, output_padding)
    ph_w, OW = _deconv_phase_params_1d(W, k, s, padding, output_padding)

    pdL = max(p["padL"] for p in ph_d); pdR = max(p["padR"] for p in ph_d)
    phL = max(p["padL"] for p in ph_h); phR = max(p["padR"] for p in ph_h)
    pwL = max(p["padL"] for p in ph_w); pwR = max(p["padR"] for p in ph_w)
    xp = jnp.pad(x.astype(jnp.bfloat16),
                 ((0, 0), (0, 0), (pdL, pdR), (phL, phR), (pwL, pwR)))

    def phase_data(rd, rh, rw):
        pd, ph, pw = ph_d[rd], ph_h[rh], ph_w[rw]
        w_sub = w[:, :, pd["taps"], :, :][:, :, :, ph["taps"], :][:, :, :, :, pw["taps"]]
        w_eq = jnp.transpose(w_sub, (1, 0, 2, 3, 4)).reshape(Cout, -1)
        sd = pd["off"] + (pdL - pd["padL"])
        sh = ph["off"] + (phL - ph["padL"])
        sw = pw["off"] + (pwL - pw["padL"])
        xv = xp[:, :,
                sd:sd + pd["Q"] + pd["n"] - 1,
                sh:sh + ph["Q"] + ph["n"] - 1,
                sw:sw + pw["Q"] + pw["n"] - 1]
        cols, _ = _im2col_cf(xv, (pd["n"], ph["n"], pw["n"]), (1, 1, 1), ((0, 0),) * 3)
        return w_eq, cols, (pd["Q"], ph["Q"], pw["Q"])

    uniform = (all(p["Q"] == ph_d[0]["Q"] for p in ph_d)
               and all(p["Q"] == ph_h[0]["Q"] for p in ph_h)
               and all(p["Q"] == ph_w[0]["Q"] for p in ph_w))

    if uniform:
        nd = max(p["n"] for p in ph_d)
        nh = max(p["n"] for p in ph_h)
        nw = max(p["n"] for p in ph_w)
        Kmax = Cin * nd * nh * nw
        w_list, c_list = [], []
        for rd in range(s):
            for rh in range(s):
                for rw in range(s):
                    w_eq, cols, _ = phase_data(rd, rh, rw)
                    kp = cols.shape[0]
                    if kp < Kmax:                         # pad taps to a common K
                        cols = jnp.pad(cols, ((0, Kmax - kp), (0, 0)))
                        w_eq = jnp.pad(w_eq, ((0, 0), (0, Kmax - kp)))
                    w_list.append(w_eq)
                    c_list.append(cols)
        w_all = jnp.stack(w_list)                         # (s^3, Cout, Kmax)
        c_all = jnp.stack(c_list)                         # (s^3, Kmax, Mph)
        out, ssum, ssq = pallas_conv_gemm(w_all, c_all, b, act=act,
                                          neg_slope=neg_slope,
                                          with_stats=with_stats)
        Qd, Qh, Qw = ph_d[0]["Q"], ph_h[0]["Q"], ph_w[0]["Q"]
        y = out.reshape(s, s, s, Cout, N, Qd, Qh, Qw)
        y = jnp.transpose(y, (3, 4, 5, 0, 6, 1, 7, 2))    # (Cout,N,Qd,rd,Qh,rh,Qw,rw)
        y = y.reshape(Cout, N, Qd * s, Qh * s, Qw * s)[:, :, :OD, :OH, :OW]
        return y, ((ssum, ssq) if with_stats else None)

    # TODO(synk): non-uniform phase sizes (odd intermediate dims) fall back to
    # one pallas_call per phase + XLA strided scatters.
    out = jnp.zeros((Cout, N, OD, OH, OW), jnp.float32)
    ssum = jnp.zeros((Cout, 1), jnp.float32) if with_stats else None
    ssq = jnp.zeros((Cout, 1), jnp.float32) if with_stats else None
    for rd in range(s):
        for rh in range(s):
            for rw in range(s):
                w_eq, cols, (Qd, Qh, Qw) = phase_data(rd, rh, rw)
                if Qd * Qh * Qw == 0:
                    continue
                y, s1, q1 = pallas_conv_gemm(w_eq, cols, b, act=act,
                                             neg_slope=neg_slope,
                                             with_stats=with_stats)
                out = out.at[:, :, rd::s, rh::s, rw::s].set(
                    y.reshape(Cout, N, Qd, Qh, Qw))
                if with_stats:
                    ssum = ssum + s1
                    ssq = ssq + q1
    return out, ((ssum, ssq) if with_stats else None)


# ----------------------------------------------------------------------------
# fused bottleneck head: embedding + clustering (Gram form) + deembedding
# ----------------------------------------------------------------------------

def _head_kernel(fc_ref, ew_ref, eb_ref, cw_ref, dw_ref, db_ref,
                 e_ref, q_ref, d_ref, *, alpha, neg_slope):
    e = jnp.dot(ew_ref[...], fc_ref[...], preferred_element_type=jnp.float32)
    e = e + eb_ref[...]                                            # (F, N)
    e_ref[...] = e

    cw = cw_ref[...]                                               # (K, F)
    xw = jnp.dot(cw, e, preferred_element_type=jnp.float32)        # (K, N)
    xx = jnp.sum(e * e, axis=0, keepdims=True)                     # (1, N)
    ww = jnp.sum(cw * cw, axis=1, keepdims=True)                   # (K, 1)
    dist = jnp.maximum(xx + ww - 2.0 * xw, 0.0)
    q = 1.0 / (1.0 + dist / alpha)
    expo = (alpha + 1.0) / 2.0
    if expo != 1.0:
        q = q ** expo
    q_ref[...] = q / jnp.sum(q, axis=0, keepdims=True)

    d = jnp.dot(dw_ref[...], e, preferred_element_type=jnp.float32)
    d = d + db_ref[...]
    d_ref[...] = jnp.where(d > 0, d, neg_slope * d)                # LeakyReLU


def pallas_head(fc_t, emb_w, emb_b, clust_w, deemb_w, deemb_b, alpha, neg_slope):
    L, N = fc_t.shape
    F = emb_w.shape[0]
    Kc = clust_w.shape[0]
    Ld = deemb_w.shape[0]

    def full(shape):
        return pl.BlockSpec(shape, lambda i, _n=len(shape): (0,) * _n)

    return pl.pallas_call(
        functools.partial(_head_kernel, alpha=alpha, neg_slope=neg_slope),
        out_shape=(jax.ShapeDtypeStruct((F, N), jnp.float32),
                   jax.ShapeDtypeStruct((Kc, N), jnp.float32),
                   jax.ShapeDtypeStruct((Ld, N), jnp.float32)),
        grid=(1,),
        in_specs=[full((L, N)), full((F, L)), full((F, 1)),
                  full((Kc, F)), full((Ld, F)), full((Ld, 1))],
        out_specs=(full((F, N)), full((Kc, N)), full((Ld, N))),
        compiler_params=pltpu.CompilerParams(dimension_semantics=("arbitrary",),
                                             vmem_limit_bytes=_VMEM_LIMIT),
    )(fc_t.astype(jnp.float32), emb_w.astype(jnp.float32),
      emb_b.reshape(F, 1).astype(jnp.float32), clust_w.astype(jnp.float32),
      deemb_w.astype(jnp.float32), deemb_b.reshape(Ld, 1).astype(jnp.float32))


# ----------------------------------------------------------------------------
# CAE_bn3 model
# ----------------------------------------------------------------------------

def init_params(key, input_shape, filters, num_clusters, num_features):
    d3 = (input_shape[0] // 2 // 2 - 1) // 2
    lin_features_len = d3 * d3 * d3 * filters[2]
    cin = input_shape[3]
    ks = jax.random.split(key, 16)

    def uni(k, shape, fan_in):
        bound = 1.0 / float(fan_in) ** 0.5
        return jax.random.uniform(k, shape, jnp.float32, -bound, bound)

    p = {}
    p["conv1_w"] = uni(ks[0], (filters[0], cin, 5, 5, 5), cin * 125)
    p["conv1_b"] = uni(ks[1], (filters[0],), cin * 125)
    p["conv2_w"] = uni(ks[2], (filters[1], filters[0], 5, 5, 5), filters[0] * 125)
    p["conv2_b"] = uni(ks[3], (filters[1],), filters[0] * 125)
    p["conv3_w"] = uni(ks[4], (filters[2], filters[1], 3, 3, 3), filters[1] * 27)
    p["conv3_b"] = uni(ks[5], (filters[2],), filters[1] * 27)
    p["emb_w"] = uni(ks[6], (num_features, lin_features_len), lin_features_len)
    p["emb_b"] = uni(ks[7], (num_features,), lin_features_len)
    p["deemb_w"] = uni(ks[8], (lin_features_len, num_features), num_features)
    p["deemb_b"] = uni(ks[9], (lin_features_len,), num_features)
    p["deconv3_w"] = uni(ks[10], (filters[2], filters[1], 3, 3, 3), filters[2] * 27)
    p["deconv3_b"] = uni(ks[11], (filters[1],), filters[2] * 27)
    p["deconv2_w"] = uni(ks[12], (filters[1], filters[0], 5, 5, 5), filters[1] * 125)
    p["deconv2_b"] = uni(ks[13], (filters[0],), filters[1] * 125)
    p["deconv1_w"] = uni(ks[14], (filters[0], cin, 5, 5, 5), filters[0] * 125)
    p["deconv1_b"] = uni(ks[15], (cin,), filters[0] * 125)
    for name, c in (("bn1_1", filters[0]), ("bn2_1", filters[1]),
                    ("bn3_2", filters[1]), ("bn2_2", filters[0])):
        p[name + "_g"] = jnp.ones((c,), jnp.float32)
        p[name + "_b"] = jnp.zeros((c,), jnp.float32)
    xav = (6.0 / (num_features + num_clusters)) ** 0.5
    p["clust_w"] = jax.random.uniform(
        jax.random.fold_in(key, 999), (num_clusters, num_features),
        jnp.float32, -xav, xav)
    return p


def cae_bn3_forward(params, x, input_shape, filters,
                    activations=False, neg_slope=0.01, alpha=1.0):
    # NOTE: BatchNorm runs in training mode (batch statistics, biased variance),
    # matching the PyTorch module's default .train() behaviour; no running stats.
    N = x.shape[0]
    d3 = (input_shape[0] // 2 // 2 - 1) // 2
    out_pad3 = 1 if input_shape[0] // 2 // 2 % 2 == 0 else 0
    out_pad2 = 1 if input_shape[0] // 2 % 2 == 0 else 0
    out_pad1 = 1 if input_shape[0] % 2 == 0 else 0

    # NCDHW -> channel-first (C, N, D, H, W); kept channel-first end-to-end.
    h = jnp.transpose(x, (1, 0, 2, 3, 4))

    # ----- encoder (BN stats fused into conv epilogues, BN apply folded fwd) ---
    h, st = conv3d_cf(h, params["conv1_w"], params["conv1_b"], 2, ((2, 2),) * 3,
                      act="leaky_relu", neg_slope=neg_slope, with_stats=True)
    sc1, sh1 = _bn_scale_shift(st, float(h[0].size),
                               params["bn1_1_g"], params["bn1_1_b"])
    h, st = conv3d_cf(h, params["conv2_w"], params["conv2_b"], 2, ((2, 2),) * 3,
                      act="leaky_relu", neg_slope=neg_slope,
                      bn_scale=sc1, bn_shift=sh1, with_stats=True)
    sc2, sh2 = _bn_scale_shift(st, float(h[0].size),
                               params["bn2_1_g"], params["bn2_1_b"])
    h, _ = conv3d_cf(h, params["conv3_w"], params["conv3_b"], 2, ((0, 0),) * 3,
                     act=("sigmoid" if activations else "leaky_relu"),
                     neg_slope=neg_slope, bn_scale=sc2, bn_shift=sh2,
                     with_stats=False)                      # (f2, N, d3, d3, d3)

    # ----- bottleneck: embedding + clustering + deembedding in one kernel -----
    fcdown1 = jnp.transpose(h, (1, 0, 2, 3, 4)).reshape(N, -1)   # torch .view(N, -1)
    e_t, q_t, d_t = pallas_head(fcdown1.T, params["emb_w"], params["emb_b"],
                                params["clust_w"], params["deemb_w"],
                                params["deemb_b"], alpha, neg_slope)
    extra_out = e_t.T                                            # (N, F)
    clustering_out = q_t.T                                       # (N, K)
    h = jnp.transpose(d_t.reshape(filters[2], d3, d3, d3, N), (0, 4, 1, 2, 3))

    # ----- decoder --------------------------------------------------------------
    h, st = conv_transpose3d_cf(h, params["deconv3_w"], params["deconv3_b"], 2,
                                0, out_pad3, act="leaky_relu",
                                neg_slope=neg_slope, with_stats=True)
    sc3, sh3 = _bn_scale_shift(st, float(h[0].size),
                               params["bn3_2_g"], params["bn3_2_b"])
    h, st = conv_transpose3d_cf(h, params["deconv2_w"], params["deconv2_b"], 2,
                                2, out_pad2, act="leaky_relu",
                                neg_slope=neg_slope, bn_scale=sc3, bn_shift=sh3,
                                with_stats=True)
    sc4, sh4 = _bn_scale_shift(st, float(h[0].size),
                               params["bn2_2_g"], params["bn2_2_b"])
    h, _ = conv_transpose3d_cf(h, params["deconv1_w"], params["deconv1_b"], 2,
                               2, out_pad1,
                               act=("tanh" if activations else "none"),
                               neg_slope=neg_slope, bn_scale=sc4, bn_shift=sh4,
                               with_stats=False)
    recon = jnp.transpose(h, (1, 0, 2, 3, 4))                    # back to NCDHW
    return recon, clustering_out, extra_out, fcdown1


# ----------------------------------------------------------------------------
# pure-JAX reference (lax conv primitives, same bf16 casts) for validation
# ----------------------------------------------------------------------------

def reference_forward(params, x, input_shape, filters,
                      activations=False, neg_slope=0.01, alpha=1.0, eps=1e-5):
    def lrelu(v):
        return jnp.where(v > 0, v, neg_slope * v)

    def conv(v, w, b, stride, pad):
        out = jax.lax.conv_general_dilated(
            v.astype(jnp.bfloat16), w.astype(jnp.bfloat16),
            window_strides=(stride,) * 3, padding=[(pad, pad)] * 3,
            dimension_numbers=("NCDHW", "OIDHW", "NCDHW"),
            preferred_element_type=jnp.float32)
        return out + b.reshape(1, -1, 1, 1, 1)

    def deconv(v, w, b, stride, pad, out_pad):
        k = w.shape[2]
        w_eq = jnp.transpose(jnp.flip(w, (2, 3, 4)), (1, 0, 2, 3, 4))
        out = jax.lax.conv_general_dilated(
            v.astype(jnp.bfloat16), w_eq.astype(jnp.bfloat16),
            window_strides=(1, 1, 1),
            padding=[(k - 1 - pad, k - 1 - pad + out_pad)] * 3,
            lhs_dilation=(stride,) * 3,
            dimension_numbers=("NCDHW", "OIDHW", "NCDHW"),
            preferred_element_type=jnp.float32)
        return out + b.reshape(1, -1, 1, 1, 1)

    def bn(v, g, bta):
        mean = jnp.mean(v, axis=(0, 2, 3, 4), keepdims=True)
        var = jnp.mean(v * v, axis=(0, 2, 3, 4), keepdims=True) - mean * mean
        return ((v - mean) * jax.lax.rsqrt(var + eps) * g.reshape(1, -1, 1, 1, 1)
                + bta.reshape(1, -1, 1, 1, 1))

    N = x.shape[0]
    h = bn(lrelu(conv(x, params["conv1_w"], params["conv1_b"], 2, 2)),
           params["bn1_1_g"], params["bn1_1_b"])
    h = bn(lrelu(conv(h, params["conv2_w"], params["conv2_b"], 2, 2)),
           params["bn2_1_g"], params["bn2_1_b"])
    h = conv(h, params["conv3_w"], params["conv3_b"], 2, 0)
    h = jax.nn.sigmoid(h) if activations else lrelu(h)
    fcdown1 = h.reshape(N, -1)
    e = fcdown1 @ params["emb_w"].T + params["emb_b"]
    diff = e[:, None, :] - params["clust_w"][None, :, :]
    dist = jnp.sum(diff * diff, axis=2)
    q = 1.0 / (1.0 + dist / alpha)
    q = q ** ((alpha + 1.0) / 2.0)
    q = q / jnp.sum(q, axis=1, keepdims=True)
    dd = lrelu(e @ params["deemb_w"].T + params["deemb_b"])
    d3 = (input_shape[0] // 2 // 2 - 1) // 2
    out_pad3 = 1 if input_shape[0] // 2 // 2 % 2 == 0 else 0
    out_pad2 = 1 if input_shape[0] // 2 % 2 == 0 else 0
    out_pad1 = 1 if input_shape[0] % 2 == 0 else 0
    h = dd.reshape(N, filters[2], d3, d3, d3)
    h = bn(lrelu(deconv(h, params["deconv3_w"], params["deconv3_b"], 2, 0, out_pad3)),
           params["bn3_2_g"], params["bn3_2_b"])
    h = bn(lrelu(deconv(h, params["deconv2_w"], params["deconv2_b"], 2, 2, out_pad2)),
           params["bn2_2_g"], params["bn2_2_b"])
    h = deconv(h, params["deconv1_w"], params["deconv1_b"], 2, 2, out_pad1)
    if activations:
        h = jnp.tanh(h)
    return h, q, e, fcdown1


# ----------------------------------------------------------------------------
# main
# ----------------------------------------------------------------------------

if __name__ == "__main__":
    input_shape = [16, 16, 16, 1]       # (D, H, W, C) as in the PyTorch module
    filters = [4, 8, 16]
    num_clusters = 10
    num_features = 32
    batch = 2

    key = jax.random.PRNGKey(0)
    pkey, xkey = jax.random.split(key)
    params = init_params(pkey, input_shape, filters, num_clusters, num_features)

    # NCDHW input, matching the PyTorch Conv3d convention
    x = jax.random.normal(
        xkey, (batch, input_shape[3], input_shape[0], input_shape[1], input_shape[2]),
        dtype=jnp.float32)

    fwd = jax.jit(functools.partial(
        cae_bn3_forward, input_shape=tuple(input_shape), filters=tuple(filters),
        activations=False))
    recon, clustering_out, extra_out, fcdown1 = fwd(params, x)
    jax.block_until_ready((recon, clustering_out, extra_out, fcdown1))

    # shape / finiteness checks
    assert recon.shape == x.shape
    assert clustering_out.shape == (batch, num_clusters)
    assert extra_out.shape == (batch, num_features)
    d3 = (input_shape[0] // 4 - 1) // 2
    assert fcdown1.shape == (batch, d3 * d3 * d3 * filters[2])
    assert bool(jnp.all(jnp.isfinite(recon)))
    assert bool(jnp.all(jnp.isfinite(clustering_out)))

    # numeric check vs a pure-JAX lax.conv reference using the same bf16 casts
    ref = jax.jit(functools.partial(
        reference_forward, input_shape=tuple(input_shape), filters=tuple(filters),
        activations=False))
    r_recon, r_q, r_e, r_fc = ref(params, x)
    jax.block_until_ready((r_recon, r_q, r_e, r_fc))

    def nerr(a, b):
        return float(jnp.max(jnp.abs(a - b) / (1.0 + jnp.abs(b))))

    assert nerr(fcdown1, r_fc) < 3e-2
    assert nerr(extra_out, r_e) < 3e-2
    assert nerr(clustering_out, r_q) < 3e-2
    assert nerr(recon, r_recon) < 3e-2

    print("KERNEL_OK")
</pallas_src>

<mosaic_0001>
module attributes {stable_mosaic.version = 11 : i64} {
  func.func @_gemm_bias_act_kernel(%arg0: i32, %arg1: memref<4x125xbf16, #tpu.memory_space<vmem>>, %arg2: memref<125x512xbf16, #tpu.memory_space<vmem>>, %arg3: memref<4x1xf32, #tpu.memory_space<vmem>>, %arg4: memref<4x512xf32, #tpu.memory_space<vmem>>, %arg5: memref<4x1xf32, #tpu.memory_space<vmem>>, %arg6: memref<4x1xf32, #tpu.memory_space<vmem>>) attributes {dimension_semantics = [#tpu.dimension_semantics<arbitrary>], iteration_bounds = array<i64: 2>, scalar_prefetch = 0 : i64, scratch_operands = 0 : i64, tpu.core_type = #tpu.core_type<tc>, window_params = [{pipeline_mode = #tpu.pipeline_mode<synchronous>, transform_indices = @transform_0, window_bounds = array<i64: 4, 125>}, {transform_indices = @transform_1, window_bounds = array<i64: 125, 512>}, {pipeline_mode = #tpu.pipeline_mode<synchronous>, transform_indices = @transform_2, window_bounds = array<i64: 4, 1>}, {transform_indices = @transform_3, window_bounds = array<i64: 4, 512>}, {pipeline_mode = #tpu.pipeline_mode<synchronous>, transform_indices = @transform_4, window_bounds = array<i64: 4, 1>}, {pipeline_mode = #tpu.pipeline_mode<synchronous>, transform_indices = @transform_5, window_bounds = array<i64: 4, 1>}]} {
    %c0 = arith.constant 0 : index
    %c0_0 = arith.constant 0 : index
    %0 = vector.load %arg1[%c0, %c0_0] : memref<4x125xbf16, #tpu.memory_space<vmem>>, vector<4x125xbf16>
    %c0_1 = arith.constant 0 : index
    %c0_2 = arith.constant 0 : index
    %1 = vector.load %arg2[%c0_1, %c0_2] : memref<125x512xbf16, #tpu.memory_space<vmem>>, vector<125x512xbf16>
    %cst = arith.constant dense<0.000000e+00> : vector<4x512xf32>
    %2 = tpu.matmul %0, %1, %cst {dimension_numbers = #tpu.dot_dimension_numbers<[1], [0], [0], [1], [0, 0, 1, 1], [], []>} : vector<4x125xbf16>, vector<125x512xbf16>, vector<4x512xf32> -> vector<4x512xf32>
    %c0_3 = arith.constant 0 : index
    %c0_4 = arith.constant 0 : index
    %3 = vector.load %arg3[%c0_3, %c0_4] : memref<4x1xf32, #tpu.memory_space<vmem>>, vector<4x1xf32>
    %4 = vector.broadcast %3 : vector<4x1xf32> to vector<4x512xf32>
    %5 = arith.addf %2, %4 : vector<4x512xf32>
    %cst_5 = arith.constant 0.000000e+00 : f32
    %6 = vector.broadcast %cst_5 : f32 to vector<4x512xf32>
    %7 = arith.cmpf ogt, %5, %6 : vector<4x512xf32>
    %cst_6 = arith.constant 0.00999999977 : f32
    %8 = vector.broadcast %cst_6 : f32 to vector<4x512xf32>
    %9 = arith.mulf %8, %5 : vector<4x512xf32>
    %10 = arith.select %7, %5, %9 : vector<4x512xi1>, vector<4x512xf32>
    %c0_7 = arith.constant 0 : index
    %c0_8 = arith.constant 0 : index
    %11 = vector.load %arg4[%c0_7, %c0_8] : memref<4x512xf32, #tpu.memory_space<vmem>>, vector<4x512xf32>
    tpu.vector_store %arg4[%c0_7, %c0_8], %10 {strides = array<i32>} : memref<4x512xf32, #tpu.memory_space<vmem>>, vector<4x512xf32>,
    %c0_i32 = arith.constant 0 : i32
    %12 = arith.cmpi eq, %arg0, %c0_i32 : i32
    %13 = arith.extui %12 : i1 to i32
    %c0_i32_9 = arith.constant 0 : i32
    %14 = arith.cmpi ne, %13, %c0_i32_9 : i32
    scf.if %14 {
      %cst_20 = arith.constant 0.000000e+00 : f32
      %26 = vector.broadcast %cst_20 : f32 to vector<4x1xf32>
      %c0_21 = arith.constant 0 : index
      %c0_22 = arith.constant 0 : index
      %27 = vector.load %arg5[%c0_21, %c0_22] : memref<4x1xf32, #tpu.memory_space<vmem>>, vector<4x1xf32>
      tpu.vector_store %arg5[%c0_21, %c0_22], %26 {strides = array<i32>} : memref<4x1xf32, #tpu.memory_space<vmem>>, vector<4x1xf32>,
      %cst_23 = arith.constant 0.000000e+00 : f32
      %28 = vector.broadcast %cst_23 : f32 to vector<4x1xf32>
      %c0_24 = arith.constant 0 : index
      %c0_25 = arith.constant 0 : index
      %29 = vector.load %arg6[%c0_24, %c0_25] : memref<4x1xf32, #tpu.memory_space<vmem>>, vector<4x1xf32>
      tpu.vector_store %arg6[%c0_24, %c0_25], %28 {strides = array<i32>} : memref<4x1xf32, #tpu.memory_space<vmem>>, vector<4x1xf32>,
    } else {
    }
    %c0_10 = arith.constant 0 : index
    %c0_11 = arith.constant 0 : index
    %15 = vector.load %arg5[%c0_10, %c0_11] : memref<4x1xf32, #tpu.memory_space<vmem>>, vector<4x1xf32>
    %cst_12 = arith.constant dense<0.000000e+00> : vector<4xf32>
    %16 = vector.multi_reduction <add>, %10, %cst_12 [1] : vector<4x512xf32> to vector<4xf32>
    %17 = vector.shape_cast %16 : vector<4xf32> to vector<4x1xf32>
    %18 = arith.addf %15, %17 : vector<4x1xf32>
    %c0_13 = arith.constant 0 : index
    %c0_14 = arith.constant 0 : index
    %19 = vector.load %arg5[%c0_13, %c0_14] : memref<4x1xf32, #tpu.memory_space<vmem>>, vector<4x1xf32>
    tpu.vector_store %arg5[%c0_13, %c0_14], %18 {strides = array<i32>} : memref<4x1xf32, #tpu.memory_space<vmem>>, vector<4x1xf32>,
    %c0_15 = arith.constant 0 : index
    %c0_16 = arith.constant 0 : index
    %20 = vector.load %arg6[%c0_15, %c0_16] : memref<4x1xf32, #tpu.memory_space<vmem>>, vector<4x1xf32>
    %21 = arith.mulf %10, %10 : vector<4x512xf32>
    %cst_17 = arith.constant dense<0.000000e+00> : vector<4xf32>
    %22 = vector.multi_reduction <add>, %21, %cst_17 [1] : vector<4x512xf32> to vector<4xf32>
    %23 = vector.shape_cast %22 : vector<4xf32> to vector<4x1xf32>
    %24 = arith.addf %20, %23 : vector<4x1xf32>
    %c0_18 = arith.constant 0 : index
    %c0_19 = arith.constant 0 : index
    %25 = vector.load %arg6[%c0_18, %c0_19] : memref<4x1xf32, #tpu.memory_space<vmem>>, vector<4x1xf32>
    tpu.vector_store %arg6[%c0_18, %c0_19], %24 {strides = array<i32>} : memref<4x1xf32, #tpu.memory_space<vmem>>, vector<4x1xf32>,
    return
  }
  func.func @transform_0(%arg0: i32) -> (i32, i32) {
    %c0_i32 = arith.constant 0 : i32
    %c0_i32_0 = arith.constant 0 : i32
    %c0_i32_1 = arith.constant 0 : i32
    return %c0_i32, %c0_i32_0 : i32, i32
  }
  func.func @transform_1(%arg0: i32) -> (i32, i32) {
    %c0_i32 = arith.constant 0 : i32
    %c0_i32_0 = arith.constant 0 : i32
    return %c0_i32, %arg0 : i32, i32
  }
  func.func @transform_2(%arg0: i32) -> (i32, i32) {
    %c0_i32 = arith.constant 0 : i32
    %c0_i32_0 = arith.constant 0 : i32
    %c0_i32_1 = arith.constant 0 : i32
    return %c0_i32, %c0_i32_0 : i32, i32
  }
  func.func @transform_3(%arg0: i32) -> (i32, i32) {
    %c0_i32 = arith.constant 0 : i32
    %c0_i32_0 = arith.constant 0 : i32
    return %c0_i32, %arg0 : i32, i32
  }
  func.func @transform_4(%arg0: i32) -> (i32, i32) {
    %c0_i32 = arith.constant 0 : i32
    %c0_i32_0 = arith.constant 0 : i32
    %c0_i32_1 = arith.constant 0 : i32
    return %c0_i32, %c0_i32_0 : i32, i32
  }
  func.func @transform_5(%arg0: i32) -> (i32, i32) {
    %c0_i32 = arith.constant 0 : i32
    %c0_i32_0 = arith.constant 0 : i32
    %c0_i32_1 = arith.constant 0 : i32
    return %c0_i32, %c0_i32_0 : i32, i32
  }
}

module attributes {stable_mosaic.version = 11 : i64} {
  func.func @_gemm_bias_act_kernel(%arg0: i32, %arg1: memref<8x500xbf16, #tpu.memory_space<vmem>>, %arg2: memref<500x128xbf16, #tpu.memory_space<vmem>>, %arg3: memref<8x1xf32, #tpu.memory_space<vmem>>, %arg4: memref<8x128xf32, #tpu.memory_space<vmem>>, %arg5: memref<8x1xf32, #tpu.memory_space<vmem>>, %arg6: memref<8x1xf32, #tpu.memory_space<vmem>>) attributes {dimension_semantics = [#tpu.dimension_semantics<arbitrary>], iteration_bounds = array<i64: 1>, scalar_prefetch = 0 : i64, scratch_operands = 0 : i64, tpu.core_type = #tpu.core_type<tc>, window_params = [{pipeline_mode = #tpu.pipeline_mode<synchronous>, transform_indices = @transform_0, window_bounds = array<i64: 8, 500>}, {transform_indices = @transform_1, window_bounds = array<i64: 500, 128>}, {pipeline_mode = #tpu.pipeline_mode<synchronous>, transform_indices = @transform_2, window_bounds = array<i64: 8, 1>}, {transform_indices = @transform_3, window_bounds = array<i64: 8, 128>}, {pipeline_mode = #tpu.pipeline_mode<synchronous>, transform_indices = @transform_4, window_bounds = array<i64: 8, 1>}, {pipeline_mode = #tpu.pipeline_mode<synchronous>, transform_indices = @transform_5, window_bounds = array<i64: 8, 1>}]} {
    %c0 = arith.constant 0 : index
    %c0_0 = arith.constant 0 : index
    %0 = vector.load %arg1[%c0, %c0_0] : memref<8x500xbf16, #tpu.memory_space<vmem>>, vector<8x500xbf16>
    %c0_1 = arith.constant 0 : index
    %c0_2 = arith.constant 0 : index
    %1 = vector.load %arg2[%c0_1, %c0_2] : memref<500x128xbf16, #tpu.memory_space<vmem>>, vector<500x128xbf16>
    %cst = arith.constant dense<0.000000e+00> : vector<8x128xf32>
    %2 = tpu.matmul %0, %1, %cst {dimension_numbers = #tpu.dot_dimension_numbers<[1], [0], [0], [1], [0, 0, 1, 1], [], []>} : vector<8x500xbf16>, vector<500x128xbf16>, vector<8x128xf32> -> vector<8x128xf32>
    %c0_3 = arith.constant 0 : index
    %c0_4 = arith.constant 0 : index
    %3 = vector.load %arg3[%c0_3, %c0_4] : memref<8x1xf32, #tpu.memory_space<vmem>>, vector<8x1xf32>
    %4 = vector.broadcast %3 : vector<8x1xf32> to vector<8x128xf32>
    %5 = arith.addf %2, %4 : vector<8x128xf32>
    %cst_5 = arith.constant 0.000000e+00 : f32
    %6 = vector.broadcast %cst_5 : f32 to vector<8x128xf32>
    %7 = arith.cmpf ogt, %5, %6 : vector<8x128xf32>
    %cst_6 = arith.constant 0.00999999977 : f32
    %8 = vector.broadcast %cst_6 : f32 to vector<8x128xf32>
    %9 = arith.mulf %8, %5 : vector<8x128xf32>
    %10 = arith.select %7, %5, %9 : vector<8x128xi1>, vector<8x128xf32>
    %c0_7 = arith.constant 0 : index
    %c0_8 = arith.constant 0 : index
    %11 = vector.load %arg4[%c0_7, %c0_8] : memref<8x128xf32, #tpu.memory_space<vmem>>, vector<8x128xf32>
    tpu.vector_store %arg4[%c0_7, %c0_8], %10 {strides = array<i32>} : memref<8x128xf32, #tpu.memory_space<vmem>>, vector<8x128xf32>,
    %c0_i32 = arith.constant 0 : i32
    %12 = arith.cmpi eq, %arg0, %c0_i32 : i32
    %13 = arith.extui %12 : i1 to i32
    %c0_i32_9 = arith.constant 0 : i32
    %14 = arith.cmpi ne, %13, %c0_i32_9 : i32
    scf.if %14 {
      %cst_20 = arith.constant 0.000000e+00 : f32
      %26 = vector.broadcast %cst_20 : f32 to vector<8x1xf32>
      %c0_21 = arith.constant 0 : index
      %c0_22 = arith.constant 0 : index
      %27 = vector.load %arg5[%c0_21, %c0_22] : memref<8x1xf32, #tpu.memory_space<vmem>>, vector<8x1xf32>
      tpu.vector_store %arg5[%c0_21, %c0_22], %26 {strides = array<i32>} : memref<8x1xf32, #tpu.memory_space<vmem>>, vector<8x1xf32>,
      %cst_23 = arith.constant 0.000000e+00 : f32
      %28 = vector.broadcast %cst_23 : f32 to vector<8x1xf32>
      %c0_24 = arith.constant 0 : index
      %c0_25 = arith.constant 0 : index
      %29 = vector.load %arg6[%c0_24, %c0_25] : memref<8x1xf32, #tpu.memory_space<vmem>>, vector<8x1xf32>
      tpu.vector_store %arg6[%c0_24, %c0_25], %28 {strides = array<i32>} : memref<8x1xf32, #tpu.memory_space<vmem>>, vector<8x1xf32>,
    } else {
    }
    %c0_10 = arith.constant 0 : index
    %c0_11 = arith.constant 0 : index
    %15 = vector.load %arg5[%c0_10, %c0_11] : memref<8x1xf32, #tpu.memory_space<vmem>>, vector<8x1xf32>
    %cst_12 = arith.constant dense<0.000000e+00> : vector<8xf32>
    %16 = vector.multi_reduction <add>, %10, %cst_12 [1] : vector<8x128xf32> to vector<8xf32>
    %17 = vector.shape_cast %16 : vector<8xf32> to vector<8x1xf32>
    %18 = arith.addf %15, %17 : vector<8x1xf32>
    %c0_13 = arith.constant 0 : index
    %c0_14 = arith.constant 0 : index
    %19 = vector.load %arg5[%c0_13, %c0_14] : memref<8x1xf32, #tpu.memory_space<vmem>>, vector<8x1xf32>
    tpu.vector_store %arg5[%c0_13, %c0_14], %18 {strides = array<i32>} : memref<8x1xf32, #tpu.memory_space<vmem>>, vector<8x1xf32>,
    %c0_15 = arith.constant 0 : index
    %c0_16 = arith.constant 0 : index
    %20 = vector.load %arg6[%c0_15, %c0_16] : memref<8x1xf32, #tpu.memory_space<vmem>>, vector<8x1xf32>
    %21 = arith.mulf %10, %10 : vector<8x128xf32>
    %cst_17 = arith.constant dense<0.000000e+00> : vector<8xf32>
    %22 = vector.multi_reduction <add>, %21, %cst_17 [1] : vector<8x128xf32> to vector<8xf32>
    %23 = vector.shape_cast %22 : vector<8xf32> to vector<8x1xf32>
    %24 = arith.addf %20, %23 : vector<8x1xf32>
    %c0_18 = arith.constant 0 : index
    %c0_19 = arith.constant 0 : index
    %25 = vector.load %arg6[%c0_18, %c0_19] : memref<8x1xf32, #tpu.memory_space<vmem>>, vector<8x1xf32>
    tpu.vector_store %arg6[%c0_18, %c0_19], %24 {strides = array<i32>} : memref<8x1xf32, #tpu.memory_space<vmem>>, vector<8x1xf32>,
    return
  }
  func.func @transform_0(%arg0: i32) -> (i32, i32) {
    %c0_i32 = arith.constant 0 : i32
    %c0_i32_0 = arith.constant 0 : i32
    %c0_i32_1 = arith.constant 0 : i32
    return %c0_i32, %c0_i32_0 : i32, i32
  }
  func.func @transform_1(%arg0: i32) -> (i32, i32) {
    %c0_i32 = arith.constant 0 : i32
    %c0_i32_0 = arith.constant 0 : i32
    return %c0_i32, %arg0 : i32, i32
  }
  func.func @transform_2(%arg0: i32) -> (i32, i32) {
    %c0_i32 = arith.constant 0 : i32
    %c0_i32_0 = arith.constant 0 : i32
    %c0_i32_1 = arith.constant 0 : i32
    return %c0_i32, %c0_i32_0 : i32, i32
  }
  func.func @transform_3(%arg0: i32) -> (i32, i32) {
    %c0_i32 = arith.constant 0 : i32
    %c0_i32_0 = arith.constant 0 : i32
    return %c0_i32, %arg0 : i32, i32
  }
  func.func @transform_4(%arg0: i32) -> (i32, i32) {
    %c0_i32 = arith.constant 0 : i32
    %c0_i32_0 = arith.constant 0 : i32
    %c0_i32_1 = arith.constant 0 : i32
    return %c0_i32, %c0_i32_0 : i32, i32
  }
  func.func @transform_5(%arg0: i32) -> (i32, i32) {
    %c0_i32 = arith.constant 0 : i32
    %c0_i32_0 = arith.constant 0 : i32
    %c0_i32_1 = arith.constant 0 : i32
    return %c0_i32, %c0_i32_0 : i32, i32
  }
}

module attributes {stable_mosaic.version = 11 : i64} {
  func.func @_gemm_bias_act_kernel(%arg0: i32, %arg1: memref<16x216xbf16, #tpu.memory_space<vmem>>, %arg2: memref<216x2xbf16, #tpu.memory_space<vmem>>, %arg3: memref<16x1xf32, #tpu.memory_space<vmem>>, %arg4: memref<16x2xf32, #tpu.memory_space<vmem>>) attributes {dimension_semantics = [#tpu.dimension_semantics<parallel>], iteration_bounds = array<i64: 1>, scalar_prefetch = 0 : i64, scratch_operands = 0 : i64, tpu.core_type = #tpu.core_type<tc>, window_params = [{pipeline_mode = #tpu.pipeline_mode<synchronous>, transform_indices = @transform_0, window_bounds = array<i64: 16, 216>}, {transform_indices = @transform_1, window_bounds = array<i64: 216, 2>}, {pipeline_mode = #tpu.pipeline_mode<synchronous>, transform_indices = @transform_2, window_bounds = array<i64: 16, 1>}, {transform_indices = @transform_3, window_bounds = array<i64: 16, 2>}]} {
    %c0 = arith.constant 0 : index
    %c0_0 = arith.constant 0 : index
    %0 = vector.load %arg1[%c0, %c0_0] : memref<16x216xbf16, #tpu.memory_space<vmem>>, vector<16x216xbf16>
    %c0_1 = arith.constant 0 : index
    %c0_2 = arith.constant 0 : index
    %1 = vector.load %arg2[%c0_1, %c0_2] : memref<216x2xbf16, #tpu.memory_space<vmem>>, vector<216x2xbf16>
    %cst = arith.constant dense<0.000000e+00> : vector<16x2xf32>
    %2 = tpu.matmul %0, %1, %cst {dimension_numbers = #tpu.dot_dimension_numbers<[1], [0], [0], [1], [0, 0, 1, 1], [], []>} : vector<16x216xbf16>, vector<216x2xbf16>, vector<16x2xf32> -> vector<16x2xf32>
    %c0_3 = arith.constant 0 : index
    %c0_4 = arith.constant 0 : index
    %3 = vector.load %arg3[%c0_3, %c0_4] : memref<16x1xf32, #tpu.memory_space<vmem>>, vector<16x1xf32>
    %4 = vector.broadcast %3 : vector<16x1xf32> to vector<16x2xf32>
    %5 = arith.addf %2, %4 : vector<16x2xf32>
    %cst_5 = arith.constant 0.000000e+00 : f32
    %6 = vector.broadcast %cst_5 : f32 to vector<16x2xf32>
    %7 = arith.cmpf ogt, %5, %6 : vector<16x2xf32>
    %cst_6 = arith.constant 0.00999999977 : f32
    %8 = vector.broadcast %cst_6 : f32 to vector<16x2xf32>
    %9 = arith.mulf %8, %5 : vector<16x2xf32>
    %10 = arith.select %7, %5, %9 : vector<16x2xi1>, vector<16x2xf32>
    %c0_7 = arith.constant 0 : index
    %c0_8 = arith.constant 0 : index
    %11 = vector.load %arg4[%c0_7, %c0_8] : memref<16x2xf32, #tpu.memory_space<vmem>>, vector<16x2xf32>
    tpu.vector_store %arg4[%c0_7, %c0_8], %10 {strides = array<i32>} : memref<16x2xf32, #tpu.memory_space<vmem>>, vector<16x2xf32>,
    return
  }
  func.func @transform_0(%arg0: i32) -> (i32, i32) {
    %c0_i32 = arith.constant 0 : i32
    %c0_i32_0 = arith.constant 0 : i32
    %c0_i32_1 = arith.constant 0 : i32
    return %c0_i32, %c0_i32_0 : i32, i32
  }
  func.func @transform_1(%arg0: i32) -> (i32, i32) {
    %c0_i32 = arith.constant 0 : i32
    %c0_i32_0 = arith.constant 0 : i32
    return %c0_i32, %arg0 : i32, i32
  }
  func.func @transform_2(%arg0: i32) -> (i32, i32) {
    %c0_i32 = arith.constant 0 : i32
    %c0_i32_0 = arith.constant 0 : i32
    %c0_i32_1 = arith.constant 0 : i32
    return %c0_i32, %c0_i32_0 : i32, i32
  }
  func.func @transform_3(%arg0: i32) -> (i32, i32) {
    %c0_i32 = arith.constant 0 : i32
    %c0_i32_0 = arith.constant 0 : i32
    return %c0_i32, %arg0 : i32, i32
  }
}

module attributes {stable_mosaic.version = 11 : i64} {
  func.func @_head_kernel(%arg0: i32, %arg1: memref<16x2xf32, #tpu.memory_space<vmem>>, %arg2: memref<32x16xf32, #tpu.memory_space<vmem>>, %arg3: memref<32x1xf32, #tpu.memory_space<vmem>>, %arg4: memref<10x32xf32, #tpu.memory_space<vmem>>, %arg5: memref<16x32xf32, #tpu.memory_space<vmem>>, %arg6: memref<16x1xf32, #tpu.memory_space<vmem>>, %arg7: memref<32x2xf32, #tpu.memory_space<vmem>>, %arg8: memref<10x2xf32, #tpu.memory_space<vmem>>, %arg9: memref<16x2xf32, #tpu.memory_space<vmem>>) attributes {dimension_semantics = [#tpu.dimension_semantics<arbitrary>], iteration_bounds = array<i64: 1>, scalar_prefetch = 0 : i64, scratch_operands = 0 : i64, tpu.core_type = #tpu.core_type<tc>, window_params = [{pipeline_mode = #tpu.pipeline_mode<synchronous>, transform_indices = @transform_0, window_bounds = array<i64: 16, 2>}, {pipeline_mode = #tpu.pipeline_mode<synchronous>, transform_indices = @transform_1, window_bounds = array<i64: 32, 16>}, {pipeline_mode = #tpu.pipeline_mode<synchronous>, transform_indices = @transform_2, window_bounds = array<i64: 32, 1>}, {pipeline_mode = #tpu.pipeline_mode<synchronous>, transform_indices = @transform_3, window_bounds = array<i64: 10, 32>}, {pipeline_mode = #tpu.pipeline_mode<synchronous>, transform_indices = @transform_4, window_bounds = array<i64: 16, 32>}, {pipeline_mode = #tpu.pipeline_mode<synchronous>, transform_indices = @transform_5, window_bounds = array<i64: 16, 1>}, {pipeline_mode = #tpu.pipeline_mode<synchronous>, transform_indices = @transform_6, window_bounds = array<i64: 32, 2>}, {pipeline_mode = #tpu.pipeline_mode<synchronous>, transform_indices = @transform_7, window_bounds = array<i64: 10, 2>}, {pipeline_mode = #tpu.pipeline_mode<synchronous>, transform_indices = @transform_8, window_bounds = array<i64: 16, 2>}]} {
    %c0 = arith.constant 0 : index
    %c0_0 = arith.constant 0 : index
    %0 = vector.load %arg2[%c0, %c0_0] : memref<32x16xf32, #tpu.memory_space<vmem>>, vector<32x16xf32>
    %c0_1 = arith.constant 0 : index
    %c0_2 = arith.constant 0 : index
    %1 = vector.load %arg1[%c0_1, %c0_2] : memref<16x2xf32, #tpu.memory_space<vmem>>, vector<16x2xf32>
    %cst = arith.constant dense<0.000000e+00> : vector<32x2xf32>
    %2 = tpu.matmul %0, %1, %cst {dimension_numbers = #tpu.dot_dimension_numbers<[1], [0], [0], [1], [0, 0, 1, 1], [], []>} : vector<32x16xf32>, vector<16x2xf32>, vector<32x2xf32> -> vector<32x2xf32>
    %c0_3 = arith.constant 0 : index
    %c0_4 = arith.constant 0 : index
    %3 = vector.load %arg3[%c0_3, %c0_4] : memref<32x1xf32, #tpu.memory_space<vmem>>, vector<32x1xf32>
    %4 = vector.broadcast %3 : vector<32x1xf32> to vector<32x2xf32>
    %5 = arith.addf %2, %4 : vector<32x2xf32>
    %c0_5 = arith.constant 0 : index
    %c0_6 = arith.constant 0 : index
    %6 = vector.load %arg7[%c0_5, %c0_6] : memref<32x2xf32, #tpu.memory_space<vmem>>, vector<32x2xf32>
    tpu.vector_store %arg7[%c0_5, %c0_6], %5 {strides = array<i32>} : memref<32x2xf32, #tpu.memory_space<vmem>>, vector<32x2xf32>,
    %c0_7 = arith.constant 0 : index
    %c0_8 = arith.constant 0 : index
    %7 = vector.load %arg4[%c0_7, %c0_8] : memref<10x32xf32, #tpu.memory_space<vmem>>, vector<10x32xf32>
    %cst_9 = arith.constant dense<0.000000e+00> : vector<10x2xf32>
    %8 = tpu.matmul %7, %5, %cst_9 {dimension_numbers = #tpu.dot_dimension_numbers<[1], [0], [0], [1], [0, 0, 1, 1], [], []>} : vector<10x32xf32>, vector<32x2xf32>, vector<10x2xf32> -> vector<10x2xf32>
    %9 = arith.mulf %5, %5 : vector<32x2xf32>
    %cst_10 = arith.constant dense<0.000000e+00> : vector<2xf32>
    %10 = vector.multi_reduction <add>, %9, %cst_10 [0] : vector<32x2xf32> to vector<2xf32>
    %11 = vector.shape_cast %10 : vector<2xf32> to vector<1x2xf32>
    %12 = arith.mulf %7, %7 : vector<10x32xf32>
    %cst_11 = arith.constant dense<0.000000e+00> : vector<10xf32>
    %13 = vector.multi_reduction <add>, %12, %cst_11 [1] : vector<10x32xf32> to vector<10xf32>
    %14 = vector.shape_cast %13 : vector<10xf32> to vector<10x1xf32>
    %15 = vector.broadcast %11 : vector<1x2xf32> to vector<10x2xf32>
    %16 = vector.broadcast %14 : vector<10x1xf32> to vector<10x2xf32>
    %17 = arith.addf %15, %16 : vector<10x2xf32>
    %cst_12 = arith.constant 2.000000e+00 : f32
    %18 = vector.broadcast %cst_12 : f32 to vector<10x2xf32>
    %19 = arith.mulf %18, %8 : vector<10x2xf32>
    %20 = arith.subf %17, %19 : vector<10x2xf32>
    %cst_13 = arith.constant 0.000000e+00 : f32
    %21 = vector.broadcast %cst_13 : f32 to vector<10x2xf32>
    %22 = arith.maximumf %20, %21 : vector<10x2xf32>
    %cst_14 = arith.constant 1.000000e+00 : f32
    %23 = vector.broadcast %cst_14 : f32 to vector<10x2xf32>
    %24 = arith.divf %22, %23 : vector<10x2xf32>
    %cst_15 = arith.constant 1.000000e+00 : f32
    %25 = vector.broadcast %cst_15 : f32 to vector<10x2xf32>
    %26 = arith.addf %25, %24 : vector<10x2xf32>
    %cst_16 = arith.constant 1.000000e+00 : f32
    %27 = vector.broadcast %cst_16 : f32 to vector<10x2xf32>
    %28 = arith.divf %27, %26 : vector<10x2xf32>
    %cst_17 = arith.constant dense<0.000000e+00> : vector<2xf32>
    %29 = vector.multi_reduction <add>, %28, %cst_17 [0] : vector<10x2xf32> to vector<2xf32>
    %30 = vector.shape_cast %29 : vector<2xf32> to vector<1x2xf32>
    %31 = vector.broadcast %30 : vector<1x2xf32> to vector<10x2xf32>
    %32 = arith.divf %28, %31 : vector<10x2xf32>
    %c0_18 = arith.constant 0 : index
    %c0_19 = arith.constant 0 : index
    %33 = vector.load %arg8[%c0_18, %c0_19] : memref<10x2xf32, #tpu.memory_space<vmem>>, vector<10x2xf32>
    tpu.vector_store %arg8[%c0_18, %c0_19], %32 {strides = array<i32>} : memref<10x2xf32, #tpu.memory_space<vmem>>, vector<10x2xf32>,
    %c0_20 = arith.constant 0 : index
    %c0_21 = arith.constant 0 : index
    %34 = vector.load %arg5[%c0_20, %c0_21] : memref<16x32xf32, #tpu.memory_space<vmem>>, vector<16x32xf32>
    %cst_22 = arith.constant dense<0.000000e+00> : vector<16x2xf32>
    %35 = tpu.matmul %34, %5, %cst_22 {dimension_numbers = #tpu.dot_dimension_numbers<[1], [0], [0], [1], [0, 0, 1, 1], [], []>} : vector<16x32xf32>, vector<32x2xf32>, vector<16x2xf32> -> vector<16x2xf32>
    %c0_23 = arith.constant 0 : index
    %c0_24 = arith.constant 0 : index
    %36 = vector.load %arg6[%c0_23, %c0_24] : memref<16x1xf32, #tpu.memory_space<vmem>>, vector<16x1xf32>
    %37 = vector.broadcast %36 : vector<16x1xf32> to vector<16x2xf32>
    %38 = arith.addf %35, %37 : vector<16x2xf32>
    %cst_25 = arith.constant 0.000000e+00 : f32
    %39 = vector.broadcast %cst_25 : f32 to vector<16x2xf32>
    %40 = arith.cmpf ogt, %38, %39 : vector<16x2xf32>
    %cst_26 = arith.constant 0.00999999977 : f32
    %41 = vector.broadcast %cst_26 : f32 to vector<16x2xf32>
    %42 = arith.mulf %41, %38 : vector<16x2xf32>
    %43 = arith.select %40, %38, %42 : vector<16x2xi1>, vector<16x2xf32>
    %c0_27 = arith.constant 0 : index
    %c0_28 = arith.constant 0 : index
    %44 = vector.load %arg9[%c0_27, %c0_28] : memref<16x2xf32, #tpu.memory_space<vmem>>, vector<16x2xf32>
    tpu.vector_store %arg9[%c0_27, %c0_28], %43 {strides = array<i32>} : memref<16x2xf32, #tpu.memory_space<vmem>>, vector<16x2xf32>,
    return
  }
  func.func @transform_0(%arg0: i32) -> (i32, i32) {
    %c0_i32 = arith.constant 0 : i32
    %c0_i32_0 = arith.constant 0 : i32
    %c0_i32_1 = arith.constant 0 : i32
    return %c0_i32, %c0_i32_0 : i32, i32
  }
  func.func @transform_1(%arg0: i32) -> (i32, i32) {
    %c0_i32 = arith.constant 0 : i32
    %c0_i32_0 = arith.constant 0 : i32
    %c0_i32_1 = arith.constant 0 : i32
    return %c0_i32, %c0_i32_0 : i32, i32
  }
  func.func @transform_2(%arg0: i32) -> (i32, i32) {
    %c0_i32 = arith.constant 0 : i32
    %c0_i32_0 = arith.constant 0 : i32
    %c0_i32_1 = arith.constant 0 : i32
    return %c0_i32, %c0_i32_0 : i32, i32
  }
  func.func @transform_3(%arg0: i32) -> (i32, i32) {
    %c0_i32 = arith.constant 0 : i32
    %c0_i32_0 = arith.constant 0 : i32
    %c0_i32_1 = arith.constant 0 : i32
    return %c0_i32, %c0_i32_0 : i32, i32
  }
  func.func @transform_4(%arg0: i32) -> (i32, i32) {
    %c0_i32 = arith.constant 0 : i32
    %c0_i32_0 = arith.constant 0 : i32
    %c0_i32_1 = arith.constant 0 : i32
    return %c0_i32, %c0_i32_0 : i32, i32
  }
  func.func @transform_5(%arg0: i32) -> (i32, i32) {
    %c0_i32 = arith.constant 0 : i32
    %c0_i32_0 = arith.constant 0 : i32
    %c0_i32_1 = arith.constant 0 : i32
    return %c0_i32, %c0_i32_0 : i32, i32
  }
  func.func @transform_6(%arg0: i32) -> (i32, i32) {
    %c0_i32 = arith.constant 0 : i32
    %c0_i32_0 = arith.constant 0 : i32
    %c0_i32_1 = arith.constant 0 : i32
    return %c0_i32, %c0_i32_0 : i32, i32
  }
  func.func @transform_7(%arg0: i32) -> (i32, i32) {
    %c0_i32 = arith.constant 0 : i32
    %c0_i32_0 = arith.constant 0 : i32
    %c0_i32_1 = arith.constant 0 : i32
    return %c0_i32, %c0_i32_0 : i32, i32
  }
  func.func @transform_8(%arg0: i32) -> (i32, i32) {
    %c0_i32 = arith.constant 0 : i32
    %c0_i32_0 = arith.constant 0 : i32
    %c0_i32_1 = arith.constant 0 : i32
    return %c0_i32, %c0_i32_0 : i32, i32
  }
}

module attributes {stable_mosaic.version = 11 : i64} {
  func.func @_gemm_bias_act_kernel(%arg0: i32, %arg1: i32, %arg2: memref<1x8x128xbf16, #tpu.memory_space<vmem>>, %arg3: memref<1x128x16xbf16, #tpu.memory_space<vmem>>, %arg4: memref<8x1xf32, #tpu.memory_space<vmem>>, %arg5: memref<1x8x16xf32, #tpu.memory_space<vmem>>, %arg6: memref<8x1xf32, #tpu.memory_space<vmem>>, %arg7: memref<8x1xf32, #tpu.memory_space<vmem>>) attributes {dimension_semantics = [#tpu.dimension_semantics<arbitrary>, #tpu.dimension_semantics<arbitrary>], iteration_bounds = array<i64: 8, 1>, scalar_prefetch = 0 : i64, scratch_operands = 0 : i64, tpu.core_type = #tpu.core_type<tc>, window_params = [{transform_indices = @transform_0, window_bounds = array<i64: 1, 8, 128>}, {transform_indices = @transform_1, window_bounds = array<i64: 1, 128, 16>}, {pipeline_mode = #tpu.pipeline_mode<synchronous>, transform_indices = @transform_2, window_bounds = array<i64: 8, 1>}, {transform_indices = @transform_3, window_bounds = array<i64: 1, 8, 16>}, {pipeline_mode = #tpu.pipeline_mode<synchronous>, transform_indices = @transform_4, window_bounds = array<i64: 8, 1>}, {pipeline_mode = #tpu.pipeline_mode<synchronous>, transform_indices = @transform_5, window_bounds = array<i64: 8, 1>}]} {
    %c0 = arith.constant 0 : index
    %c0_0 = arith.constant 0 : index
    %c0_1 = arith.constant 0 : index
    %0 = vector.load %arg2[%c0, %c0_0, %c0_1] : memref<1x8x128xbf16, #tpu.memory_space<vmem>>, vector<1x8x128xbf16>
    %1 = vector.shape_cast %0 : vector<1x8x128xbf16> to vector<8x128xbf16>
    %c0_2 = arith.constant 0 : index
    %c0_3 = arith.constant 0 : index
    %c0_4 = arith.constant 0 : index
    %2 = vector.load %arg3[%c0_2, %c0_3, %c0_4] : memref<1x128x16xbf16, #tpu.memory_space<vmem>>, vector<1x128x16xbf16>
    %3 = vector.shape_cast %2 : vector<1x128x16xbf16> to vector<128x16xbf16>
    %cst = arith.constant dense<0.000000e+00> : vector<8x16xf32>
    %4 = tpu.matmul %1, %3, %cst {dimension_numbers = #tpu.dot_dimension_numbers<[1], [0], [0], [1], [0, 0, 1, 1], [], []>} : vector<8x128xbf16>, vector<128x16xbf16>, vector<8x16xf32> -> vector<8x16xf32>
    %c0_5 = arith.constant 0 : index
    %c0_6 = arith.constant 0 : index
    %5 = vector.load %arg4[%c0_5, %c0_6] : memref<8x1xf32, #tpu.memory_space<vmem>>, vector<8x1xf32>
    %6 = vector.broadcast %5 : vector<8x1xf32> to vector<8x16xf32>
    %7 = arith.addf %4, %6 : vector<8x16xf32>
    %cst_7 = arith.constant 0.000000e+00 : f32
    %8 = vector.broadcast %cst_7 : f32 to vector<8x16xf32>
    %9 = arith.cmpf ogt, %7, %8 : vector<8x16xf32>
    %cst_8 = arith.constant 0.00999999977 : f32
    %10 = vector.broadcast %cst_8 : f32 to vector<8x16xf32>
    %11 = arith.mulf %10, %7 : vector<8x16xf32>
    %12 = arith.select %9, %7, %11 : vector<8x16xi1>, vector<8x16xf32>
    %c0_9 = arith.constant 0 : index
    %c0_10 = arith.constant 0 : index
    %c0_11 = arith.constant 0 : index
    %13 = vector.load %arg5[%c0_9, %c0_10, %c0_11] : memref<1x8x16xf32, #tpu.memory_space<vmem>>, vector<1x8x16xf32>
    %14 = vector.shape_cast %13 : vector<1x8x16xf32> to vector<8x16xf32>
    %15 = vector.shape_cast %12 : vector<8x16xf32> to vector<1x8x16xf32>
    tpu.vector_store %arg5[%c0_9, %c0_10, %c0_11], %15 {strides = array<i32>} : memref<1x8x16xf32, #tpu.memory_space<vmem>>, vector<1x8x16xf32>,
    %c0_i32 = arith.constant 0 : i32
    %16 = arith.cmpi eq, %arg0, %c0_i32 : i32
    %c0_i32_12 = arith.constant 0 : i32
    %17 = arith.cmpi eq, %arg1, %c0_i32_12 : i32
    %18 = arith.andi %16, %17 : i1
    %19 = arith.extui %18 : i1 to i32
    %c0_i32_13 = arith.constant 0 : i32
    %20 = arith.cmpi ne, %19, %c0_i32_13 : i32
    scf.if %20 {
      %cst_24 = arith.constant 0.000000e+00 : f32
      %32 = vector.broadcast %cst_24 : f32 to vector<8x1xf32>
      %c0_25 = arith.constant 0 : index
      %c0_26 = arith.constant 0 : index
      %33 = vector.load %arg6[%c0_25, %c0_26] : memref<8x1xf32, #tpu.memory_space<vmem>>, vector<8x1xf32>
      tpu.vector_store %arg6[%c0_25, %c0_26], %32 {strides = array<i32>} : memref<8x1xf32, #tpu.memory_space<vmem>>, vector<8x1xf32>,
      %cst_27 = arith.constant 0.000000e+00 : f32
      %34 = vector.broadcast %cst_27 : f32 to vector<8x1xf32>
      %c0_28 = arith.constant 0 : index
      %c0_29 = arith.constant 0 : index
      %35 = vector.load %arg7[%c0_28, %c0_29] : memref<8x1xf32, #tpu.memory_space<vmem>>, vector<8x1xf32>
      tpu.vector_store %arg7[%c0_28, %c0_29], %34 {strides = array<i32>} : memref<8x1xf32, #tpu.memory_space<vmem>>, vector<8x1xf32>,
    } else {
    }
    %c0_14 = arith.constant 0 : index
    %c0_15 = arith.constant 0 : index
    %21 = vector.load %arg6[%c0_14, %c0_15] : memref<8x1xf32, #tpu.memory_space<vmem>>, vector<8x1xf32>
    %cst_16 = arith.constant dense<0.000000e+00> : vector<8xf32>
    %22 = vector.multi_reduction <add>, %12, %cst_16 [1] : vector<8x16xf32> to vector<8xf32>
    %23 = vector.shape_cast %22 : vector<8xf32> to vector<8x1xf32>
    %24 = arith.addf %21, %23 : vector<8x1xf32>
    %c0_17 = arith.constant 0 : index
    %c0_18 = arith.constant 0 : index
    %25 = vector.load %arg6[%c0_17, %c0_18] : memref<8x1xf32, #tpu.memory_space<vmem>>, vector<8x1xf32>
    tpu.vector_store %arg6[%c0_17, %c0_18], %24 {strides = array<i32>} : memref<8x1xf32, #tpu.memory_space<vmem>>, vector<8x1xf32>,
    %c0_19 = arith.constant 0 : index
    %c0_20 = arith.constant 0 : index
    %26 = vector.load %arg7[%c0_19, %c0_20] : memref<8x1xf32, #tpu.memory_space<vmem>>, vector<8x1xf32>
    %27 = arith.mulf %12, %12 : vector<8x16xf32>
    %cst_21 = arith.constant dense<0.000000e+00> : vector<8xf32>
    %28 = vector.multi_reduction <add>, %27, %cst_21 [1] : vector<8x16xf32> to vector<8xf32>
    %29 = vector.shape_cast %28 : vector<8xf32> to vector<8x1xf32>
    %30 = arith.addf %26, %29 : vector<8x1xf32>
    %c0_22 = arith.constant 0 : index
    %c0_23 = arith.constant 0 : index
    %31 = vector.load %arg7[%c0_22, %c0_23] : memref<8x1xf32, #tpu.memory_space<vmem>>, vector<8x1xf32>
    tpu.vector_store %arg7[%c0_22, %c0_23], %30 {strides = array<i32>} : memref<8x1xf32, #tpu.memory_space<vmem>>, vector<8x1xf32>,
    return
  }
  func.func @transform_0(%arg0: i32, %arg1: i32) -> (i32, i32, i32) {
    %c0_i32 = arith.constant 0 : i32
    %c0_i32_0 = arith.constant 0 : i32
    %c0_i32_1 = arith.constant 0 : i32
    return %arg0, %c0_i32, %c0_i32_0 : i32, i32, i32
  }
  func.func @transform_1(%arg0: i32, %arg1: i32) -> (i32, i32, i32) {
    %c0_i32 = arith.constant 0 : i32
    %c0_i32_0 = arith.constant 0 : i32
    return %arg0, %c0_i32, %arg1 : i32, i32, i32
  }
  func.func @transform_2(%arg0: i32, %arg1: i32) -> (i32, i32) {
    %c0_i32 = arith.constant 0 : i32
    %c0_i32_0 = arith.constant 0 : i32
    %c0_i32_1 = arith.constant 0 : i32
    return %c0_i32, %c0_i32_0 : i32, i32
  }
  func.func @transform_3(%arg0: i32, %arg1: i32) -> (i32, i32, i32) {
    %c0_i32 = arith.constant 0 : i32
    %c0_i32_0 = arith.constant 0 : i32
    return %arg0, %c0_i32, %arg1 : i32, i32, i32
  }
  func.func @transform_4(%arg0: i32, %arg1: i32) -> (i32, i32) {
    %c0_i32 = arith.constant 0 : i32
    %c0_i32_0 = arith.constant 0 : i32
    %c0_i32_1 = arith.constant 0 : i32
    return %c0_i32, %c0_i32_0 : i32, i32
  }
  func.func @transform_5(%arg0: i32, %arg1: i32) -> (i32, i32) {
    %c0_i32 = arith.constant 0 : i32
    %c0_i32_0 = arith.constant 0 : i32
    %c0_i32_1 = arith.constant 0 : i32
    return %c0_i32, %c0_i32_0 : i32, i32
  }
}

module attributes {stable_mosaic.version = 11 : i64} {
  func.func @_gemm_bias_act_kernel(%arg0: i32, %arg1: i32, %arg2: memref<1x4x216xbf16, #tpu.memory_space<vmem>>, %arg3: memref<1x216x128xbf16, #tpu.memory_space<vmem>>, %arg4: memref<4x1xf32, #tpu.memory_space<vmem>>, %arg5: memref<1x4x128xf32, #tpu.memory_space<vmem>>, %arg6: memref<4x1xf32, #tpu.memory_space<vmem>>, %arg7: memref<4x1xf32, #tpu.memory_space<vmem>>) attributes {dimension_semantics = [#tpu.dimension_semantics<arbitrary>, #tpu.dimension_semantics<arbitrary>], iteration_bounds = array<i64: 8, 1>, scalar_prefetch = 0 : i64, scratch_operands = 0 : i64, tpu.core_type = #tpu.core_type<tc>, window_params = [{transform_indices = @transform_0, window_bounds = array<i64: 1, 4, 216>}, {transform_indices = @transform_1, window_bounds = array<i64: 1, 216, 128>}, {pipeline_mode = #tpu.pipeline_mode<synchronous>, transform_indices = @transform_2, window_bounds = array<i64: 4, 1>}, {transform_indices = @transform_3, window_bounds = array<i64: 1, 4, 128>}, {pipeline_mode = #tpu.pipeline_mode<synchronous>, transform_indices = @transform_4, window_bounds = array<i64: 4, 1>}, {pipeline_mode = #tpu.pipeline_mode<synchronous>, transform_indices = @transform_5, window_bounds = array<i64: 4, 1>}]} {
    %c0 = arith.constant 0 : index
    %c0_0 = arith.constant 0 : index
    %c0_1 = arith.constant 0 : index
    %0 = vector.load %arg2[%c0, %c0_0, %c0_1] : memref<1x4x216xbf16, #tpu.memory_space<vmem>>, vector<1x4x216xbf16>
    %1 = vector.shape_cast %0 : vector<1x4x216xbf16> to vector<4x216xbf16>
    %c0_2 = arith.constant 0 : index
    %c0_3 = arith.constant 0 : index
    %c0_4 = arith.constant 0 : index
    %2 = vector.load %arg3[%c0_2, %c0_3, %c0_4] : memref<1x216x128xbf16, #tpu.memory_space<vmem>>, vector<1x216x128xbf16>
    %3 = vector.shape_cast %2 : vector<1x216x128xbf16> to vector<216x128xbf16>
    %cst = arith.constant dense<0.000000e+00> : vector<4x128xf32>
    %4 = tpu.matmul %1, %3, %cst {dimension_numbers = #tpu.dot_dimension_numbers<[1], [0], [0], [1], [0, 0, 1, 1], [], []>} : vector<4x216xbf16>, vector<216x128xbf16>, vector<4x128xf32> -> vector<4x128xf32>
    %c0_5 = arith.constant 0 : index
    %c0_6 = arith.constant 0 : index
    %5 = vector.load %arg4[%c0_5, %c0_6] : memref<4x1xf32, #tpu.memory_space<vmem>>, vector<4x1xf32>
    %6 = vector.broadcast %5 : vector<4x1xf32> to vector<4x128xf32>
    %7 = arith.addf %4, %6 : vector<4x128xf32>
    %cst_7 = arith.constant 0.000000e+00 : f32
    %8 = vector.broadcast %cst_7 : f32 to vector<4x128xf32>
    %9 = arith.cmpf ogt, %7, %8 : vector<4x128xf32>
    %cst_8 = arith.constant 0.00999999977 : f32
    %10 = vector.broadcast %cst_8 : f32 to vector<4x128xf32>
    %11 = arith.mulf %10, %7 : vector<4x128xf32>
    %12 = arith.select %9, %7, %11 : vector<4x128xi1>, vector<4x128xf32>
    %c0_9 = arith.constant 0 : index
    %c0_10 = arith.constant 0 : index
    %c0_11 = arith.constant 0 : index
    %13 = vector.load %arg5[%c0_9, %c0_10, %c0_11] : memref<1x4x128xf32, #tpu.memory_space<vmem>>, vector<1x4x128xf32>
    %14 = vector.shape_cast %13 : vector<1x4x128xf32> to vector<4x128xf32>
    %15 = vector.shape_cast %12 : vector<4x128xf32> to vector<1x4x128xf32>
    tpu.vector_store %arg5[%c0_9, %c0_10, %c0_11], %15 {strides = array<i32>} : memref<1x4x128xf32, #tpu.memory_space<vmem>>, vector<1x4x128xf32>,
    %c0_i32 = arith.constant 0 : i32
    %16 = arith.cmpi eq, %arg0, %c0_i32 : i32
    %c0_i32_12 = arith.constant 0 : i32
    %17 = arith.cmpi eq, %arg1, %c0_i32_12 : i32
    %18 = arith.andi %16, %17 : i1
    %19 = arith.extui %18 : i1 to i32
    %c0_i32_13 = arith.constant 0 : i32
    %20 = arith.cmpi ne, %19, %c0_i32_13 : i32
    scf.if %20 {
      %cst_24 = arith.constant 0.000000e+00 : f32
      %32 = vector.broadcast %cst_24 : f32 to vector<4x1xf32>
      %c0_25 = arith.constant 0 : index
      %c0_26 = arith.constant 0 : index
      %33 = vector.load %arg6[%c0_25, %c0_26] : memref<4x1xf32, #tpu.memory_space<vmem>>, vector<4x1xf32>
      tpu.vector_store %arg6[%c0_25, %c0_26], %32 {strides = array<i32>} : memref<4x1xf32, #tpu.memory_space<vmem>>, vector<4x1xf32>,
      %cst_27 = arith.constant 0.000000e+00 : f32
      %34 = vector.broadcast %cst_27 : f32 to vector<4x1xf32>
      %c0_28 = arith.constant 0 : index
      %c0_29 = arith.constant 0 : index
      %35 = vector.load %arg7[%c0_28, %c0_29] : memref<4x1xf32, #tpu.memory_space<vmem>>, vector<4x1xf32>
      tpu.vector_store %arg7[%c0_28, %c0_29], %34 {strides = array<i32>} : memref<4x1xf32, #tpu.memory_space<vmem>>, vector<4x1xf32>,
    } else {
    }
    %c0_14 = arith.constant 0 : index
    %c0_15 = arith.constant 0 : index
    %21 = vector.load %arg6[%c0_14, %c0_15] : memref<4x1xf32, #tpu.memory_space<vmem>>, vector<4x1xf32>
    %cst_16 = arith.constant dense<0.000000e+00> : vector<4xf32>
    %22 = vector.multi_reduction <add>, %12, %cst_16 [1] : vector<4x128xf32> to vector<4xf32>
    %23 = vector.shape_cast %22 : vector<4xf32> to vector<4x1xf32>
    %24 = arith.addf %21, %23 : vector<4x1xf32>
    %c0_17 = arith.constant 0 : index
    %c0_18 = arith.constant 0 : index
    %25 = vector.load %arg6[%c0_17, %c0_18] : memref<4x1xf32, #tpu.memory_space<vmem>>, vector<4x1xf32>
    tpu.vector_store %arg6[%c0_17, %c0_18], %24 {strides = array<i32>} : memref<4x1xf32, #tpu.memory_space<vmem>>, vector<4x1xf32>,
    %c0_19 = arith.constant 0 : index
    %c0_20 = arith.constant 0 : index
    %26 = vector.load %arg7[%c0_19, %c0_20] : memref<4x1xf32, #tpu.memory_space<vmem>>, vector<4x1xf32>
    %27 = arith.mulf %12, %12 : vector<4x128xf32>
    %cst_21 = arith.constant dense<0.000000e+00> : vector<4xf32>
    %28 = vector.multi_reduction <add>, %27, %cst_21 [1] : vector<4x128xf32> to vector<4xf32>
    %29 = vector.shape_cast %28 : vector<4xf32> to vector<4x1xf32>
    %30 = arith.addf %26, %29 : vector<4x1xf32>
    %c0_22 = arith.constant 0 : index
    %c0_23 = arith.constant 0 : index
    %31 = vector.load %arg7[%c0_22, %c0_23] : memref<4x1xf32, #tpu.memory_space<vmem>>, vector<4x1xf32>
    tpu.vector_store %arg7[%c0_22, %c0_23], %30 {strides = array<i32>} : memref<4x1xf32, #tpu.memory_space<vmem>>, vector<4x1xf32>,
    return
  }
  func.func @transform_0(%arg0: i32, %arg1: i32) -> (i32, i32, i32) {
    %c0_i32 = arith.constant 0 : i32
    %c0_i32_0 = arith.constant 0 : i32
    %c0_i32_1 = arith.constant 0 : i32
    return %arg0, %c0_i32, %c0_i32_0 : i32, i32, i32
  }
  func.func @transform_1(%arg0: i32, %arg1: i32) -> (i32, i32, i32) {
    %c0_i32 = arith.constant 0 : i32
    %c0_i32_0 = arith.constant 0 : i32
    return %arg0, %c0_i32, %arg1 : i32, i32, i32
  }
  func.func @transform_2(%arg0: i32, %arg1: i32) -> (i32, i32) {
    %c0_i32 = arith.constant 0 : i32
    %c0_i32_0 = arith.constant 0 : i32
    %c0_i32_1 = arith.constant 0 : i32
    return %c0_i32, %c0_i32_0 : i32, i32
  }
  func.func @transform_3(%arg0: i32, %arg1: i32) -> (i32, i32, i32) {
    %c0_i32 = arith.constant 0 : i32
    %c0_i32_0 = arith.constant 0 : i32
    return %arg0, %c0_i32, %arg1 : i32, i32, i32
  }
  func.func @transform_4(%arg0: i32, %arg1: i32) -> (i32, i32) {
    %c0_i32 = arith.constant 0 : i32
    %c0_i32_0 = arith.constant 0 : i32
    %c0_i32_1 = arith.constant 0 : i32
    return %c0_i32, %c0_i32_0 : i32, i32
  }
  func.func @transform_5(%arg0: i32, %arg1: i32) -> (i32, i32) {
    %c0_i32 = arith.constant 0 : i32
    %c0_i32_0 = arith.constant 0 : i32
    %c0_i32_1 = arith.constant 0 : i32
    return %c0_i32, %c0_i32_0 : i32, i32
  }
}

module attributes {stable_mosaic.version = 11 : i64} {
  func.func @_gemm_bias_act_kernel(%arg0: i32, %arg1: i32, %arg2: memref<1x1x108xbf16, #tpu.memory_space<vmem>>, %arg3: memref<1x108x512xbf16, #tpu.memory_space<vmem>>, %arg4: memref<1x1xf32, #tpu.memory_space<vmem>>, %arg5: memref<1x1x512xf32, #tpu.memory_space<vmem>>) attributes {dimension_semantics = [#tpu.dimension_semantics<parallel>, #tpu.dimension_semantics<parallel>], iteration_bounds = array<i64: 8, 2>, scalar_prefetch = 0 : i64, scratch_operands = 0 : i64, tpu.core_type = #tpu.core_type<tc>, window_params = [{transform_indices = @transform_0, window_bounds = array<i64: 1, 1, 108>}, {transform_indices = @transform_1, window_bounds = array<i64: 1, 108, 512>}, {pipeline_mode = #tpu.pipeline_mode<synchronous>, transform_indices = @transform_2, window_bounds = array<i64: 1, 1>}, {transform_indices = @transform_3, window_bounds = array<i64: 1, 1, 512>}]} {
    %c0 = arith.constant 0 : index
    %c0_0 = arith.constant 0 : index
    %c0_1 = arith.constant 0 : index
    %0 = vector.load %arg2[%c0, %c0_0, %c0_1] : memref<1x1x108xbf16, #tpu.memory_space<vmem>>, vector<1x1x108xbf16>
    %1 = vector.shape_cast %0 : vector<1x1x108xbf16> to vector<1x108xbf16>
    %c0_2 = arith.constant 0 : index
    %c0_3 = arith.constant 0 : index
    %c0_4 = arith.constant 0 : index
    %2 = vector.load %arg3[%c0_2, %c0_3, %c0_4] : memref<1x108x512xbf16, #tpu.memory_space<vmem>>, vector<1x108x512xbf16>
    %3 = vector.shape_cast %2 : vector<1x108x512xbf16> to vector<108x512xbf16>
    %cst = arith.constant dense<0.000000e+00> : vector<1x512xf32>
    %4 = tpu.matmul %1, %3, %cst {dimension_numbers = #tpu.dot_dimension_numbers<[1], [0], [0], [1], [0, 0, 1, 1], [], []>} : vector<1x108xbf16>, vector<108x512xbf16>, vector<1x512xf32> -> vector<1x512xf32>
    %c0_5 = arith.constant 0 : index
    %c0_6 = arith.constant 0 : index
    %5 = vector.load %arg4[%c0_5, %c0_6] : memref<1x1xf32, #tpu.memory_space<vmem>>, vector<1x1xf32>
    %6 = vector.broadcast %5 : vector<1x1xf32> to vector<1x512xf32>
    %7 = arith.addf %4, %6 : vector<1x512xf32>
    %c0_7 = arith.constant 0 : index
    %c0_8 = arith.constant 0 : index
    %c0_9 = arith.constant 0 : index
    %8 = vector.load %arg5[%c0_7, %c0_8, %c0_9] : memref<1x1x512xf32, #tpu.memory_space<vmem>>, vector<1x1x512xf32>
    %9 = vector.shape_cast %8 : vector<1x1x512xf32> to vector<1x512xf32>
    %10 = vector.shape_cast %7 : vector<1x512xf32> to vector<1x1x512xf32>
    tpu.vector_store %arg5[%c0_7, %c0_8, %c0_9], %10 {strides = array<i32>} : memref<1x1x512xf32, #tpu.memory_space<vmem>>, vector<1x1x512xf32>,
    return
  }
  func.func @transform_0(%arg0: i32, %arg1: i32) -> (i32, i32, i32) {
    %c0_i32 = arith.constant 0 : i32
    %c0_i32_0 = arith.constant 0 : i32
    %c0_i32_1 = arith.constant 0 : i32
    return %arg0, %c0_i32, %c0_i32_0 : i32, i32, i32
  }
  func.func @transform_1(%arg0: i32, %arg1: i32) -> (i32, i32, i32) {
    %c0_i32 = arith.constant 0 : i32
    %c0_i32_0 = arith.constant 0 : i32
    return %arg0, %c0_i32, %arg1 : i32, i32, i32
  }
  func.func @transform_2(%arg0: i32, %arg1: i32) -> (i32, i32) {
    %c0_i32 = arith.constant 0 : i32
    %c0_i32_0 = arith.constant 0 : i32
    %c0_i32_1 = arith.constant 0 : i32
    return %c0_i32, %c0_i32_0 : i32, i32
  }
  func.func @transform_3(%arg0: i32, %arg1: i32) -> (i32, i32, i32) {
    %c0_i32 = arith.constant 0 : i32
    %c0_i32_0 = arith.constant 0 : i32
    return %arg0, %c0_i32, %arg1 : i32, i32, i32
  }
}

</mosaic_0001>

<bundles_post_ra>
// kernel: cae_bn3_forward.7
= control target key start
LH: loop header
LB: loop body
LE: loop exit
PB: predicated region body
PF: predicated region fallthrough
CT: control target
= control target key end

     0   :  { %s917_s18 = smov 0   ;;  %s919_s19 = smov 0   ;;  %s1105_s0 = inlined_call_operand.vmem [shape: bf16[4,125], index: 0, kind: input, shape index: {}]   ;;  %s1106_s1 = inlined_call_operand.vmem [shape: bf16[125,1024], index: 1, kind: input, shape index: {}]   ;;  %s1107_s2 = inlined_call_operand.vmem [shape: f32[4,1], index: 2, kind: input, shape index: {}]   ;;  %s1108_s3 = inlined_call_operand.vmem [shape: f32[4,1024], index: 3, kind: output, shape index: {0}]   ;;  %s1109_s4 = inlined_call_operand.vmem [shape: f32[4,1], index: 4, kind: output, shape index: {1}]   ;;  %s1110_s5 = inlined_call_operand.vmem [shape: f32[4,1], index: 5, kind: output, shape index: {2}]  }
   0x1   :  { %s921_s20 = smov 0  }
   0x2 LB: > { %s735_s21 = sadd.s32 4294967295, %s882_s20   ;;  %s934_s22 = sadd.s32 1, %s882_s20   ;;  %s882_s20 = sphi %s921_s20, %s1113_s20   ;;  %s878_s19 = sphi %s919_s19, %s1112_s19   ;;  %s874_s18 = sphi %s917_s18, %s1111_s18  }
   0x3   : > { %s41_s23 = ssub.s32 %s882_s20, %s934_s22  ;;  %s44_s24 = sadd.s32 1, %s878_s19 }
   0x4   : > { %p42_p0 = scmp.eq.s32.totalorder %s41_s23, 0  ;;  %p51_p1 = scmp.ne.s32.totalorder %s878_s19, %s874_s18 }
   0x5   : > { %p52_p2 = scmp.eq.s32.totalorder %s882_s20, 0  ;;  %p738_p4 = scmp.ge.s32.totalorder %s882_s20, 2 }
   0x6   : > { %s943_s25 = scalar_select %p42_p0, %s878_s19, %s44_s24  }
   0x7   : > { %p53_p3 = por %p52_p2, %p51_p1  ;;  %172 = sbr.rel (%p738_p4) target bundleno = 34 (0x22), region = 24 }
   0xe   : > { %175 = sbr.rel (!%p53_p3) target bundleno = 34 (0x22), region = 28  ;;  %s177_s26 = sand.u32 (%p53_p3), 1, %s878_s19  }
   0xf   : > { %s783_s27 = sshll.u32 (%p53_p3), %s882_s20, 4  ;;  %s739_s28 = sshll.u32 (%p53_p3), %s177_s26, 8 }
  0x10   : > { %s951_s6 = scalar_lea.vmem (%p53_p3), %s1106_s1, %s783_s27  ;;  %s956_s7 = scalar_lea.vmem (%p53_p3), [#allocation2], %s739_s28 }
  0x11   : > { %v195_v0 = vld [vmem:[%s951_s6] sm:$0xff] (%p53_p3)  ;;  %v197_v1 = vld [vmem:[%s951_s6 + $0x8] sm:$0xff] (%p53_p3) }
  0x12   : > { %v199_v2 = vld [vmem:[%s951_s6 + $0x20] sm:$0xff] (%p53_p3)  ;;  %196 = vst [vmem:[%s956_s7] sm:$0xff] (%p53_p3), %v195_v0  ;;  %198 = vst [vmem:[%s956_s7 + $0x8] sm:$0xff] (%p53_p3), %v197_v1  ;;  %v201_v3 = vld [vmem:[%s951_s6 + $0x28] sm:$0xff] (%p53_p3) }
  0x13   : > { %200 = vst [vmem:[%s956_s7 + $0x10] sm:$0xff] (%p53_p3), %v199_v2  ;;  %v203_v4 = vld [vmem:[%s951_s6 + $0x40] sm:$0xff] (%p53_p3)  ;;  %v205_v5 = vld [vmem:[%s951_s6 + $0x48] sm:$0xff] (%p53_p3)  ;;  %202 = vst [vmem:[%s956_s7 + $0x18] sm:$0xff] (%p53_p3), %v201_v3 }
  0x14   : > { %204 = vst [vmem:[%s956_s7 + $0x20] sm:$0xff] (%p53_p3), %v203_v4  ;;  %206 = vst [vmem:[%s956_s7 + $0x28] sm:$0xff] (%p53_p3), %v205_v5  ;;  %v207_v6 = vld [vmem:[%s951_s6 + $0x60] sm:$0xff] (%p53_p3)  ;;  %v209_v7 = vld [vmem:[%s951_s6 + $0x68] sm:$0xff] (%p53_p3) }
  0x15   : > { %v211_v8 = vld [vmem:[%s951_s6 + $0x80] sm:$0xff]  ;;  %208 = vst [vmem:[%s956_s7 + $0x30] sm:$0xff] %v207_v6  ;;  %210 = vst [vmem:[%s956_s7 + $0x38] sm:$0xff] %v209_v7  ;;  %v213_v9 = vld [vmem:[%s951_s6 + $0x88] sm:$0xff] }
  0x16   : > { %212 = vst [vmem:[%s956_s7 + $0x40] sm:$0xff] %v211_v8  ;;  %v215_v10 = vld [vmem:[%s951_s6 + $0xa0] sm:$0xff]  ;;  %v217_v11 = vld [vmem:[%s951_s6 + $0xa8] sm:$0xff]  ;;  %214 = vst [vmem:[%s956_s7 + $0x48] sm:$0xff] %v213_v9 }
  0x17   : > { %216 = vst [vmem:[%s956_s7 + $0x50] sm:$0xff] %v215_v10  ;;  %218 = vst [vmem:[%s956_s7 + $0x58] sm:$0xff] %v217_v11  ;;  %v219_v12 = vld [vmem:[%s951_s6 + $0xc0] sm:$0xff]  ;;  %v221_v13 = vld [vmem:[%s951_s6 + $0xc8] sm:$0xff] }
  0x18   : > { %v223_v14 = vld [vmem:[%s951_s6 + $0xe0] sm:$0xff]  ;;  %220 = vst [vmem:[%s956_s7 + $0x60] sm:$0xff] %v219_v12  ;;  %222 = vst [vmem:[%s956_s7 + $0x68] sm:$0xff] %v221_v13  ;;  %v225_v15 = vld [vmem:[%s951_s6 + $0xe8] sm:$0xff] }
  0x19   : > { %224 = vst [vmem:[%s956_s7 + $0x70] sm:$0xff] %v223_v14  ;;  %v227_v16 = vld [vmem:[%s951_s6 + $0x100] sm:$0xff]  ;;  %v229_v17 = vld [vmem:[%s951_s6 + $0x108] sm:$0xff]  ;;  %226 = vst [vmem:[%s956_s7 + $0x78] sm:$0xff] %v225_v15 }
  0x1a   : > { %228 = vst [vmem:[%s956_s7 + $0x80] sm:$0xff] %v227_v16  ;;  %230 = vst [vmem:[%s956_s7 + $0x88] sm:$0xff] %v229_v17  ;;  %v231_v18 = vld [vmem:[%s951_s6 + $0x120] sm:$0xff]  ;;  %v233_v19 = vld [vmem:[%s951_s6 + $0x128] sm:$0xff] }
  0x1b   : > { %v235_v20 = vld [vmem:[%s951_s6 + $0x140] sm:$0xff]  ;;  %232 = vst [vmem:[%s956_s7 + $0x90] sm:$0xff] %v231_v18  ;;  %234 = vst [vmem:[%s956_s7 + $0x98] sm:$0xff] %v233_v19  ;;  %v237_v21 = vld [vmem:[%s951_s6 + $0x148] sm:$0xff] }
  0x1c   : > { %236 = vst [vmem:[%s956_s7 + $0xa0] sm:$0xff] %v235_v20  ;;  %v239_v22 = vld [vmem:[%s951_s6 + $0x160] sm:$0xff]  ;;  %v241_v23 = vld [vmem:[%s951_s6 + $0x168] sm:$0xff]  ;;  %238 = vst [vmem:[%s956_s7 + $0xa8] sm:$0xff] %v237_v21 }
  0x1d   : > { %240 = vst [vmem:[%s956_s7 + $0xb0] sm:$0xff] %v239_v22  ;;  %242 = vst [vmem:[%s956_s7 + $0xb8] sm:$0xff] %v241_v23  ;;  %v243_v24 = vld [vmem:[%s951_s6 + $0x180] sm:$0xff]  ;;  %v245_v25 = vld [vmem:[%s951_s6 + $0x188] sm:$0xff] }
  0x1e   : > { %v247_v26 = vld [vmem:[%s951_s6 + $0x1a0] sm:$0xff]  ;;  %244 = vst [vmem:[%s956_s7 + $0xc0] sm:$0xff] %v243_v24  ;;  %246 = vst [vmem:[%s956_s7 + $0xc8] sm:$0xff] %v245_v25  ;;  %v249_v27 = vld [vmem:[%s951_s6 + $0x1a8] sm:$0xff] }
  0x1f   : > { %248 = vst [vmem:[%s956_s7 + $0xd0] sm:$0xff] %v247_v26  ;;  %v251_v28 = vld [vmem:[%s951_s6 + $0x1c0] sm:$0xff]  ;;  %v253_v29 = vld [vmem:[%s951_s6 + $0x1c8] sm:$0xff]  ;;  %250 = vst [vmem:[%s956_s7 + $0xd8] sm:$0xff] %v249_v27 }
  0x20   : > { %252 = vst [vmem:[%s956_s7 + $0xe0] sm:$0xff] %v251_v28  ;;  %254 = vst [vmem:[%s956_s7 + $0xe8] sm:$0xff] %v253_v29  ;;  %v255_v30 = vld [vmem:[%s951_s6 + $0x1e0] sm:$0xff]  ;;  %v257_v31 = vld [vmem:[%s951_s6 + $0x1e8] sm:$0xff] }
  0x21   : > { %256 = vst [vmem:[%s956_s7 + $0xf0] sm:$0xff] %v255_v30  ;;  %258 = vst [vmem:[%s956_s7 + $0xf8] sm:$0xff] %v257_v31 }
  0x22 PF: > { %p742_p5 = scmp.ge.s32.totalorder %s882_s20, 1  ;;  %p263_p6 = scmp.lt.s32.totalorder %s882_s20, 3 }
  0x24   : > { %p264_p7 = pnand %p742_p5, %p263_p6 }
  0x25   : > { %s270_s8 = sand.u32 (!%p264_p7), 1, %s874_s18   ;;  %v884_v32 = vmov (!%p264_p7), 0   ;;  %v338_v33 = vld [vmem:[%s1107_s2] sm:$0xf] (!%p264_p7)  ;;  %vm504_vm0 = vcmask (!%p264_p7), 1045504   ;;  %vm505_vm1 = vcmask (!%p264_p7), 1046528  }
  0x26   : > { %267 = sbr.rel (%p264_p7) target bundleno = 453 (0x1c5), region = 51  ;;  %s743_s9 = sshll.u32 (!%p264_p7), %s270_s8, 8  ;;  %552 = vmatprep.mubr.bf16.mxu0 (!%p264_p7), %v884_v32  ;;  %593 = vmatprep.mubr.bf16.mxu1 (!%p264_p7), %v884_v32  ;;  %v885_v58 = vmov (!%p264_p7), 65535   ;;  %v305_v9 = vld [vmem:[%s1105_s0] sm:$0x3] (!%p264_p7)  ;;  %vm500_vm2 = vcmask (!%p264_p7), 1022976  }
  0x27   : > { %811 = vset.pattern.permute.xlu0 (!%p264_p7), %v884_v32  ;;  %s1025_s12 = scalar_lea.vmem (!%p264_p7), [#allocation2], %s743_s9  ;;  %v506_v59 = vsel (!%p264_p7), %vm504_vm0, 4294967295, %v885_v58  ;;  %s744_s15 = sshll.u32 (!%p264_p7), %s735_s21, 2 }
  0x28   : > { %v812_v34 = vld [vmem:[%s1025_s12 + $0x4] ss:$16 sps:$4 sm:$0xff] (!%p264_p7)   ;;  %341 = vperm.xlu0 (!%p264_p7), %811, %v338_v33   ;;  %v814_v35 = vld [vmem:[%s1025_s12 + $0xc] ss:$16 sps:$4 sm:$0xff] (!%p264_p7)   ;;  %v816_v36 = vld [vmem:[%s1025_s12] ss:$16 sps:$4 sm:$0xff] (!%p264_p7)  }
  0x29   : > { %520 = vmatprep.subr.bf16.mxu0 (!%p264_p7), %v812_v34  ;;  %v817_v37 = vld [vmem:[%s1025_s12 + $0x8] ss:$16 sps:$4 sm:$0xff] (!%p264_p7)   ;;  %561 = vmatprep.subr.bf16.mxu1 (!%p264_p7), %v814_v35  ;;  %v818_v38 = vld [vmem:[%s1025_s12 + $0x24] ss:$16 sps:$4 sm:$0xff] (!%p264_p7)   ;;  %v820_v39 = vld [vmem:[%s1025_s12 + $0x2c] ss:$16 sps:$4 sm:$0xff] (!%p264_p7)  }
  0x2a   : > { %521 = vmatpush1.bf16.msra.mxu0 (!%p264_p7), %v816_v36  ;;  %562 = vmatpush1.bf16.msra.mxu1 (!%p264_p7), %v817_v37  ;;  %v822_v40 = vld [vmem:[%s1025_s12 + $0x20] ss:$16 sps:$4 sm:$0xff] (!%p264_p7)   ;;  %v823_v41 = vld [vmem:[%s1025_s12 + $0x28] ss:$16 sps:$4 sm:$0xff] (!%p264_p7)   ;;  %v824_v42 = vld [vmem:[%s1025_s12 + $0x44] ss:$16 sps:$4 sm:$0xff] (!%p264_p7)  }
  0x2b   : > { %522 = vmatprep.subr.bf16.mxu0 (!%p264_p7), %v818_v38  ;;  %563 = vmatprep.subr.bf16.mxu1 (!%p264_p7), %v820_v39  ;;  %v826_v43 = vld [vmem:[%s1025_s12 + $0x4c] ss:$16 sps:$4 sm:$0xff] (!%p264_p7)   ;;  %v828_v44 = vld [vmem:[%s1025_s12 + $0x40] ss:$16 sps:$4 sm:$0xff] (!%p264_p7)   ;;  %v829_v45 = vld [vmem:[%s1025_s12 + $0x48] ss:$16 sps:$4 sm:$0xff] (!%p264_p7)  }
  0x2c   : > { %v830_v46 = vld [vmem:[%s1025_s12 + $0x64] ss:$16 sps:$4 sm:$0xff] (!%p264_p7)   ;;  %v832_v47 = vld [vmem:[%s1025_s12 + $0x6c] ss:$16 sps:$4 sm:$0xff] (!%p264_p7)   ;;  %v834_v48 = vld [vmem:[%s1025_s12 + $0x60] ss:$16 sps:$4 sm:$0xff] (!%p264_p7)  }
  0x2d   : > { %v835_v49 = vld [vmem:[%s1025_s12 + $0x68] ss:$16 sps:$4 sm:$0xff]   ;;  %v836_v50 = vld [vmem:[%s1025_s12 + $0x84] ss:$16 sps:$4 sm:$0xff]   ;;  %v838_v51 = vld [vmem:[%s1025_s12 + $0x8c] ss:$16 sps:$4 sm:$0xff]  }
  0x2e   : > { %523 = vmatpush1.bf16.msra.mxu0 %v822_v40  ;;  %564 = vmatpush1.bf16.msra.mxu1 %v823_v41  ;;  %v840_v52 = vld [vmem:[%s1025_s12 + $0x80] ss:$16 sps:$4 sm:$0xff]   ;;  %v841_v53 = vld [vmem:[%s1025_s12 + $0x88] ss:$16 sps:$4 sm:$0xff]   ;;  %v842_v54 = vld [vmem:[%s1025_s12 + $0xa4] ss:$16 sps:$4 sm:$0xff]  }
  0x2f   : > { %524 = vmatprep.subr.bf16.mxu0 %v824_v42  ;;  %565 = vmatprep.subr.bf16.mxu1 %v826_v43  ;;  %v844_v55 = vld [vmem:[%s1025_s12 + $0xac] ss:$16 sps:$4 sm:$0xff]   ;;  %v846_v56 = vld [vmem:[%s1025_s12 + $0xa0] ss:$16 sps:$4 sm:$0xff]   ;;  %v847_v57 = vld [vmem:[%s1025_s12 + $0xa8] ss:$16 sps:$4 sm:$0xff]  }
  0x30   : > { %v848_v60 = vld [vmem:[%s1025_s12 + $0xc4] ss:$16 sps:$4 sm:$0xff]   ;;  %v850_v61 = vld [vmem:[%s1025_s12 + $0xcc] ss:$16 sps:$4 sm:$0xff]   ;;  %v507_v0 = vsel %vm505_vm1, %v506_v59, 0  ;;  %p299_p8 = scmp.lt.s32.totalorder %s744_s15, 7 }
  0x31   : > { %v854_v62 = vld [vmem:[%s1025_s12 + $0xe4] ss:$16 sps:$4 sm:$0x7f]   ;;  %v856_v63 = vld [vmem:[%s1025_s12 + $0xec] ss:$16 sps:$4 sm:$0x7f]  }
  0x32   : > { %525 = vmatpush1.bf16.msra.mxu0 %v828_v44  ;;  %566 = vmatpush1.bf16.msra.mxu1 %v829_v45  ;;  %v852_v1 = vld [vmem:[%s1025_s12 + $0xc0] ss:$16 sps:$4 sm:$0xff]   ;;  %v853_v2 = vld [vmem:[%s1025_s12 + $0xc8] ss:$16 sps:$4 sm:$0xff]   ;;  %v512_v5 = vand.u32 %v854_v62, %v507_v0  ;;  %v518_v6 = vand.u32 %v856_v63, %v507_v0  ;;  %s1115_s15 = smov (!%p299_p8, %s744_s15), 7  ;;  %p780_p9 = scmp.ne.s32.totalorder %s735_s21, 0 }
  0x33   : > { %526 = vmatprep.subr.bf16.mxu0 %v830_v46  ;;  %567 = vmatprep.subr.bf16.mxu1 %v832_v47  ;;  %v858_v3 = vld [vmem:[%s1025_s12 + $0xe0] ss:$16 sps:$4 sm:$0x7f]   ;;  %v859_v4 = vld [vmem:[%s1025_s12 + $0xe8] ss:$16 sps:$4 sm:$0x7f]  }
  0x34   : > { %v509_v7 = vand.u32 %v858_v3, %v507_v0  ;;  %v515_v8 = vand.u32 %v859_v4, %v507_v0  ;;  %s745_s16 = sshll.u32 %s1115_s15, 2  ;;  %vm628_vm7 = vcmask (!%p780_p9), 3072   ;;  %v886_v33 = vmov (!%p780_p9), 0.0  }
  0x35   : > { %s302_s23 = scalar_lea.vmem %s1108_s3, %s745_s16  ;;  %629 = vst.msk [vmem:[%s1109_s4] sm:$0xf] (!%p780_p9), %vm628_vm7, %v886_v33  ;;  %630 = vst.msk [vmem:[%s1110_s5] sm:$0xf] (!%p780_p9), %vm628_vm7, %v886_v33 }
  0x36   : > { %527 = vmatpush1.bf16.msra.mxu0 %v834_v48  ;;  %568 = vmatpush1.bf16.msra.mxu1 %v835_v49 }
  0x37   : > { %528 = vmatprep.subr.bf16.mxu0 %v836_v50  ;;  %569 = vmatprep.subr.bf16.mxu1 %v838_v51 }
  0x3a   : > { %529 = vmatpush1.bf16.msra.mxu0 %v840_v52  ;;  %570 = vmatpush1.bf16.msra.mxu1 %v841_v53 }
  0x3b   : > { %530 = vmatprep.subr.bf16.mxu0 %v842_v54  ;;  %571 = vmatprep.subr.bf16.mxu1 %v844_v55 }
  0x3e   : > { %531 = vmatpush1.bf16.msra.mxu0 %v846_v56  ;;  %572 = vmatpush1.bf16.msra.mxu1 %v847_v57 }
  0x3f   : > { %532 = vmatprep.subr.bf16.mxu0 %v848_v60  ;;  %573 = vmatprep.subr.bf16.mxu1 %v850_v61 }
  0x42   : > { %533 = vmatpush1.bf16.msra.mxu0 %v852_v1  ;;  %574 = vmatpush1.bf16.msra.mxu1 %v853_v2 }
  0x43   : > { %534 = vmatprep.subr.bf16.mxu0 %v512_v5  ;;  %575 = vmatprep.subr.bf16.mxu1 %v518_v6 }
  0x46   : > { %535 = vmatpush1.bf16.msra.mxu0 %v509_v7  ;;  %576 = vmatpush1.bf16.msra.mxu1 %v515_v8 }
  0x49   : > { %778 = vmatmul.mubr.msk.bf16.vlgmr.msra.gmra.mrb[0].mxu0 %vm500_vm2, %v305_v9  ;;  %779 = vmatmul.mubr.msk.bf16.vlgmr.msra.gmra.mrb[0].mxu1 %vm500_vm2, %v305_v9 }
  0xa7   : > { %v342_v10 = vpop.permute.xlu0 %341 }
 0x11c   : > { %v554_v11 = vpop.f32.mrb[0].mxu0  ;;  %v595_v12 = vpop.f32.mrb[0].mxu1 }
 0x11d   : > { %v555_v13 = vadd.f32 %v554_v11, %v342_v10  ;;  %v596_v14 = vadd.f32 %v595_v12, %v342_v10  ;;  %v556_v15 = vpop.f32.mrb[1].mxu0  ;;  %v597_v16 = vpop.f32.mrb[1].mxu1 }
 0x11e   : > { %v557_v17 = vadd.f32 %v556_v15, %v342_v10  ;;  %v598_v18 = vadd.f32 %v597_v16, %v342_v10  ;;  %v558_v19 = vpop.f32.mrb[2].mxu0  ;;  %v599_v20 = vpop.f32.mrb[2].mxu1 }
 0x11f   : > { %vm602_vm3 = vcmp.gt.f32.partialorder %v555_v13, 0.0  ;;  %v606_v21 = vmul.f32 0.01, %v555_v13  ;;  %vm604_vm4 = vcmp.gt.f32.partialorder %v596_v14, 0.0  ;;  %v608_v22 = vmul.f32 0.01, %v596_v14 }
 0x120   : > { %vm603_vm5 = vcmp.gt.f32.partialorder %v557_v17, 0.0  ;;  %v607_v23 = vmul.f32 0.01, %v557_v17  ;;  %vm605_vm6 = vcmp.gt.f32.partialorder %v598_v18, 0.0  ;;  %v609_v24 = vmul.f32 0.01, %v598_v18 }
 0x121   : > { %v610_v25 = vsel %vm602_vm3, %v555_v13, %v606_v21  ;;  %v612_v26 = vsel %vm604_vm4, %v596_v14, %v608_v22  ;;  %v559_v27 = vpop.f32.mrb[3].mxu0  ;;  %v600_v28 = vpop.f32.mrb[3].mxu1  ;;  %627 = sbr.rel (%p780_p9) target bundleno = 296 (0x128), region = 59 }
 0x122   : > { %v611_v29 = vsel %vm603_vm5, %v557_v17, %v607_v23  ;;  %v613_v30 = vsel %vm605_vm6, %v598_v18, %v609_v24 }
 0x123   : > { %v618_v31 = vcombine.low %v610_v25, %v611_v29  ;;  %v619_v32 = vcombine.low %v612_v26, %v613_v30 }
 0x125   : > { %622 = vst [vmem:[%s302_s23] sm:$0xff] %v618_v31  ;;  %623 = vst [vmem:[%s302_s23 + $0x8] sm:$0xff] %v619_v32 }
 0x128 PF: > { %vm632_vm8 = vcmask 1043456   ;;  %v646_v34 = vmul.f32 %v610_v25, %v610_v25  ;;  %v647_v35 = vmul.f32 %v611_v29, %v611_v29  ;;  %v648_v36 = vmul.f32 %v612_v26, %v612_v26  ;;  %v631_v52 = vld [vmem:[%s1109_s4] sm:$0xf] }
 0x129   : > { %v633_v37 = vsel %vm632_vm8, %v610_v25, 0.0  ;;  %v634_v38 = vsel %vm632_vm8, %v611_v29, 0.0  ;;  %v636_v39 = vsel %vm632_vm8, %v612_v26, 0.0  ;;  %v649_v41 = vmul.f32 %v613_v30, %v613_v30  ;;  %v645_v55 = vld [vmem:[%s1110_s5] sm:$0xf] }
 0x12a   : > { %v635_v40 = vadd.f32 %v634_v38, %v633_v37  ;;  %v650_v42 = vsel %vm632_vm8, %v646_v34, 0.0  ;;  %v651_v43 = vsel %vm632_vm8, %v647_v35, 0.0  ;;  %v638_v44 = vsel %vm632_vm8, %v613_v30, 0.0 }
 0x12b   : > { %v652_v45 = vadd.f32 %v651_v43, %v650_v42  ;;  %v653_v46 = vsel %vm632_vm8, %v648_v36, 0.0  ;;  %v655_v49 = vsel %vm632_vm8, %v649_v41, 0.0  ;;  %vm643_vm9 = vcmask 3072  }
 0x12c   : > { %v637_v47 = vadd.f32 %v636_v39, %v635_v40 }
 0x12d   : > { %v654_v48 = vadd.f32 %v653_v46, %v652_v45 }
 0x12e   : > { %v639_v50 = vadd.f32 %v638_v44, %v637_v47 }
 0x12f   : > { %v656_v51 = vadd.f32 %v655_v49, %v654_v48 }
 0x130   : > { %640 = vadd.xlane.f32.xlu0 %v639_v50 }
 0x134   : > { %657 = vadd.xlane.f32.xlu0 %v656_v51 }
 0x1bd   : > { %v641_v53 = vpop.xlane.xlu0 %640 }
 0x1be   : > { %v642_v54 = vadd.f32 %v641_v53, %v631_v52 }
 0x1c0   : > { %644 = vst.msk [vmem:[%s1109_s4] sm:$0xf] %vm643_vm9, %v642_v54 }
 0x1c1   : > { %v658_v56 = vpop.xlane.xlu0 %657 }
 0x1c2   : > { %v659_v57 = vadd.f32 %v658_v56, %v645_v55 }
 0x1c4   : > { %660 = vst.msk [vmem:[%s1110_s5] sm:$0xf] %vm643_vm9, %v659_v57 }
 0x1c5 PF: > { %p13_p10 = scmp.ge.s32.totalorder %s934_s22, 4   ;;  %s1111_s18 = smov %s878_s19 }
 0x1c6   : > { %s1112_s19 = smov %s943_s25  ;;  %s1113_s20 = smov %s934_s22 }
 0x1c7   :  { %15 = sbr.rel (!%p13_p10) target bundleno = 2 (0x2), region = 110 }

// kernel: cae_bn3_forward.8
= control target key start
LH: loop header
LB: loop body
LE: loop exit
PB: predicated region body
PF: predicated region fallthrough
CT: control target
= control target key end

     0   :  { %v535_v1 = vmov 0   ;;  %vm295_vm0 = vcmask 1041408   ;;  %vm291_vm1 = vcmask 949248   ;;  %vm387_vm2 = vcmask 7168   ;;  %s697_s1 = inlined_call_operand.vmem [shape: bf16[500,128], index: 1, kind: input, shape index: {}]   ;;  %s698_s0 = inlined_call_operand.vmem [shape: bf16[8,500], index: 0, kind: input, shape index: {}]   ;;  %s699_s2 = inlined_call_operand.vmem [shape: f32[8,1], index: 2, kind: input, shape index: {}]   ;;  %s700_s4 = inlined_call_operand.vmem [shape: f32[8,1], index: 4, kind: output, shape index: {1}]   ;;  %s701_s3 = inlined_call_operand.vmem [shape: f32[8,128], index: 3, kind: output, shape index: {0}]   ;;  %s702_s5 = inlined_call_operand.vmem [shape: f32[8,1], index: 5, kind: output, shape index: {2}]  }
   0x1   :  { %v499_v0 = vld [vmem:[%s697_s1 + $0x40] sm:$0xff]   ;;  %498 = vset.pattern.permute.xlu0 %v535_v1  ;;  %v503_v5 = vld [vmem:[%s697_s1 + $0x48] sm:$0xff]   ;;  %v507_v9 = vld [vmem:[%s697_s1 + $0x50] sm:$0xff]   ;;  %v536_v40 = vmov 0.0  }
   0x2   :  { %v500_v2 = vld [vmem:[%s697_s1 + $0xc0] sm:$0xff]   ;;  %451 = vmatprep.subr.bf16.mxu0 %v499_v0  ;;  %v504_v6 = vld [vmem:[%s697_s1 + $0xc8] sm:$0xff]   ;;  %v508_v10 = vld [vmem:[%s697_s1 + $0xd0] sm:$0xff]   ;;  %388 = vst.msk [vmem:[%s700_s4] sm:$0xff] %vm387_vm2, %v536_v40 }
   0x3   :  { %v501_v3 = vld [vmem:[%s697_s1] sm:$0xff]   ;;  %473 = vmatprep.subr.bf16.mxu1 %v500_v2  ;;  %v505_v7 = vld [vmem:[%s697_s1 + $0x8] sm:$0xff]   ;;  %v509_v11 = vld [vmem:[%s697_s1 + $0x10] sm:$0xff]   ;;  %389 = vst.msk [vmem:[%s702_s5] sm:$0xff] %vm387_vm2, %v536_v40 }
   0x4   :  { %v502_v4 = vld [vmem:[%s697_s1 + $0x80] sm:$0xff]   ;;  %452 = vmatpush3.bf16.msra.mxu0 %v501_v3  ;;  %v506_v8 = vld [vmem:[%s697_s1 + $0x88] sm:$0xff]   ;;  %v510_v12 = vld [vmem:[%s697_s1 + $0x90] sm:$0xff]  }
   0x5   :  { %474 = vmatpush3.bf16.msra.mxu1 %v502_v4  ;;  %453 = vmatprep.subr.bf16.mxu0 %v503_v5  ;;  %v511_v13 = vld [vmem:[%s697_s1 + $0x58] sm:$0xff]   ;;  %v515_v17 = vld [vmem:[%s697_s1 + $0x60] sm:$0xff]   ;;  %v519_v21 = vld [vmem:[%s697_s1 + $0x68] sm:$0xff]  }
   0x6   :  { %475 = vmatprep.subr.bf16.mxu1 %v504_v6  ;;  %v512_v14 = vld [vmem:[%s697_s1 + $0xd8] sm:$0xff]   ;;  %v516_v18 = vld [vmem:[%s697_s1 + $0xe0] sm:$0xff]   ;;  %v520_v22 = vld [vmem:[%s697_s1 + $0xe8] sm:$0xff]  }
   0x7   :  { %v513_v15 = vld [vmem:[%s697_s1 + $0x18] sm:$0xff]   ;;  %v517_v19 = vld [vmem:[%s697_s1 + $0x20] sm:$0xff]   ;;  %v521_v23 = vld [vmem:[%s697_s1 + $0x28] sm:$0xff]  }
   0x8   :  { %454 = vmatpush3.bf16.msra.mxu0 %v505_v7  ;;  %v514_v16 = vld [vmem:[%s697_s1 + $0x98] sm:$0xff]   ;;  %v518_v20 = vld [vmem:[%s697_s1 + $0xa0] sm:$0xff]   ;;  %v522_v24 = vld [vmem:[%s697_s1 + $0xa8] sm:$0xff]  }
   0x9   :  { %476 = vmatpush3.bf16.msra.mxu1 %v506_v8  ;;  %455 = vmatprep.subr.bf16.mxu0 %v507_v9  ;;  %v523_v25 = vld [vmem:[%s697_s1 + $0x70] sm:$0xff]   ;;  %v527_v29 = vld [vmem:[%s697_s1 + $0x78] sm:$0xff]   ;;  %v18_v33 = vld [vmem:[%s698_s0] sm:$0xff] }
   0xa   :  { %477 = vmatprep.subr.bf16.mxu1 %v508_v10  ;;  %v524_v26 = vld [vmem:[%s697_s1 + $0xf0] sm:$0xff]   ;;  %v528_v30 = vld [vmem:[%s697_s1 + $0xf8] ss:$0 sps:$4 sm:$0x33]   ;;  %v414_v34 = vcombine.low %v18_v33, %v18_v33  ;;  %v415_v35 = vcombine.high %v18_v33, %v18_v33  ;;  %v19_v36 = vld [vmem:[%s698_s0 + $0x8] sm:$0xff] }
   0xb   :  { %v525_v27 = vld [vmem:[%s697_s1 + $0x30] sm:$0xff]   ;;  %v529_v31 = vld [vmem:[%s697_s1 + $0x38] sm:$0xff]   ;;  %v83_v37 = vld [vmem:[%s699_s2] sm:$0xff]  ;;  %v416_v38 = vcombine.low %v19_v36, %v19_v36  ;;  %v417_v39 = vcombine.high %v19_v36, %v19_v36 }
   0xc   :  { %456 = vmatpush3.bf16.msra.mxu0 %v509_v11  ;;  %v526_v28 = vld [vmem:[%s697_s1 + $0xb0] sm:$0xff]   ;;  %v530_v32 = vld [vmem:[%s697_s1 + $0xb8] sm:$0xff]   ;;  %86 = vperm.xlu0 %498, %v83_v37   ;;  %v390_v57 = vld [vmem:[%s700_s4] sm:$0xff] }
   0xd   :  { %478 = vmatpush3.bf16.msra.mxu1 %v510_v12  ;;  %457 = vmatprep.subr.bf16.mxu0 %v511_v13  ;;  %v396_v59 = vld [vmem:[%s702_s5] sm:$0xff] }
   0xe   :  { %479 = vmatprep.subr.bf16.mxu1 %v512_v14  ;;  %331 = vmatprep.mubr.bf16.mxu0 %v415_v35 }
   0xf   :  { %450 = vmatprep.mubr.msk.bf16.mxu1 %vm291_vm1, %v417_v39 }
  0x10   :  { %458 = vmatpush3.bf16.msra.mxu0 %v513_v15 }
  0x11   :  { %480 = vmatpush3.bf16.msra.mxu1 %v514_v16  ;;  %459 = vmatprep.subr.bf16.mxu0 %v515_v17 }
  0x12   :  { %481 = vmatprep.subr.bf16.mxu1 %v516_v18 }
  0x14   :  { %460 = vmatpush3.bf16.msra.mxu0 %v517_v19 }
  0x15   :  { %482 = vmatpush3.bf16.msra.mxu1 %v518_v20  ;;  %461 = vmatprep.subr.bf16.mxu0 %v519_v21 }
  0x16   :  { %483 = vmatprep.subr.bf16.mxu1 %v520_v22 }
  0x18   :  { %462 = vmatpush3.bf16.msra.mxu0 %v521_v23 }
  0x19   :  { %484 = vmatpush3.bf16.msra.mxu1 %v522_v24  ;;  %463 = vmatprep.subr.bf16.mxu0 %v523_v25 }
  0x1a   :  { %485 = vmatprep.subr.bf16.mxu1 %v524_v26 }
  0x1c   :  { %464 = vmatpush3.bf16.msra.mxu0 %v525_v27 }
  0x1d   :  { %486 = vmatpush3.bf16.msra.mxu1 %v526_v28  ;;  %465 = vmatprep.subr.bf16.mxu0 %v527_v29 }
  0x1e   :  { %495 = vmatprep.subr.msk.bf16.mxu1 %vm295_vm0, %v528_v30 }
  0x20   :  { %466 = vmatpush3.bf16.msra.mxu0 %v529_v31 }
  0x21   :  { %488 = vmatpush3.bf16.msra.mxu1 %v530_v32 }
  0x23   :  { %332 = vmatmul.mubr.bf16.vlgmr.msra.gmra.mrb[0].mxu0 %v414_v34 }
  0x24   :  { %372 = vmatmul.mubr.bf16.vlgmr.msra.gmra.mrb[0].mxu1 %v416_v38 }
  0x8b   :  { %v87_v42 = vpop.permute.xlu0 %86 }
  0xf6   :  { %v467_v41 = vpop.f32.mrb[0].mxu0 }
  0xf7   :  { %v489_v43 = vpop.f32.mrb[0].mxu1  ;;  %v468_v44 = vpop.f32.mrb[1].mxu0 }
  0xf8   :  { %v469_v45 = vadd.f32 %v468_v44, %v467_v41  ;;  %v490_v46 = vpop.f32.mrb[1].mxu1  ;;  %v470_v47 = vpop.f32.mrb[2].mxu0 }
  0xf9   :  { %v491_v48 = vadd.f32 %v490_v46, %v489_v43  ;;  %v492_v49 = vpop.f32.mrb[2].mxu1  ;;  %v471_v50 = vpop.f32.mrb[3].mxu0 }
  0xfa   :  { %v334_v51 = vadd.f32 %v469_v45, %v87_v42  ;;  %v493_v52 = vpop.f32.mrb[3].mxu1 }
  0xfc   :  { %v374_v53 = vadd.f32 %v491_v48, %v334_v51 }
  0xfe   :  { %vm379_vm3 = vcmp.gt.f32.partialorder %v374_v53, 0.0  ;;  %v380_v54 = vmul.f32 0.01, %v374_v53 }
 0x100   :  { %v381_v55 = vsel %vm379_vm3, %v374_v53, %v380_v54 }
 0x101   :  { %391 = vadd.xlane.f32.xlu0 %v381_v55  ;;  %382 = vst [vmem:[%s701_s3] sm:$0xff] %v381_v55  ;;  %v397_v56 = vmul.f32 %v381_v55, %v381_v55 }
 0x103   :  { %398 = vadd.xlane.f32.xlu1 %v397_v56 }
 0x18e   :  { %v392_v58 = vpop.xlane.xlu0 %391 }
 0x18f   :  { %v393_v60 = vadd.f32 %v392_v58, %v390_v57 }
 0x190   :  { %v399_v61 = vpop.xlane.xlu1 %398 }
 0x191   :  { %395 = vst.msk [vmem:[%s700_s4] sm:$0xff] %vm387_vm2, %v393_v60  ;;  %v400_v62 = vadd.f32 %v399_v61, %v396_v59 }
 0x193   :  { %401 = vst.msk [vmem:[%s702_s5] sm:$0xff] %vm387_vm2, %v400_v62 }

// kernel: cae_bn3_forward.9
= control target key start
LH: loop header
LB: loop body
LE: loop exit
PB: predicated region body
PF: predicated region fallthrough
CT: control target
= control target key end

     0   :  { %v244_v0 = vmov 0   ;;  %vm146_vm0 = vcmask 719872   ;;  %vm150_vm1 = vcmask 1043456   ;;  %vm201_vm3 = vcmask 15360   ;;  %s325_s1 = inlined_call_operand.vmem [shape: bf16[216,2], index: 1, kind: input, shape index: {}]   ;;  %s326_s0 = inlined_call_operand.vmem [shape: bf16[16,216], index: 0, kind: input, shape index: {}]   ;;  %s327_s2 = inlined_call_operand.vmem [shape: f32[16,1], index: 2, kind: input, shape index: {}]   ;;  %s328_s3 = inlined_call_operand.vmem [shape: f32[16,2], index: 3, kind: output, shape index: {}]  }
   0x1   :  { %154 = vmatprep.subr.bf16.mxu0 %v244_v0  ;;  %v227_v1 = vld [vmem:[%s325_s1] sm:$0xff]   ;;  %226 = vset.pattern.permute.xlu0 %v244_v0  ;;  %v228_v2 = vld [vmem:[%s325_s1 + $0x8] sm:$0xff]   ;;  %v229_v3 = vld [vmem:[%s325_s1 + $0x10] sm:$0xff]  }
   0x2   :  { %155 = vmatpush1.bf16.msra.mxu0 %v227_v1  ;;  %v230_v4 = vld [vmem:[%s325_s1 + $0x18] sm:$0xff]   ;;  %v231_v5 = vld [vmem:[%s325_s1 + $0x20] sm:$0xff]   ;;  %v45_v8 = vld [vmem:[%s327_s2 + $0x8] sm:$0xff] }
   0x3   :  { %156 = vmatprep.subr.bf16.mxu0 %v244_v0  ;;  %v243_v6 = vld [vmem:[%s326_s0 + $0x4] ss:$8 sps:$4 sm:$0xff]   ;;  %v233_v10 = vld [vmem:[%s325_s1 + $0x30] sm:$0xff]   ;;  %v234_v11 = vld [vmem:[%s325_s1 + $0x38] sm:$0xff]  }
   0x4   :  { %v44_v7 = vld [vmem:[%s327_s2] sm:$0xff]  ;;  %224 = vmatprep.mubr.msk.bf16.mxu0 %vm146_vm0, %v243_v6  ;;  %v232_v9 = vld [vmem:[%s325_s1 + $0x28] sm:$0xff]   ;;  %v237_v14 = vld [vmem:[%s325_s1 + $0x50] sm:$0xff]  }
   0x5   :  { %48 = vperm.xlu0 %226, %v44_v7   ;;  %v235_v12 = vld [vmem:[%s325_s1 + $0x40] sm:$0xff]   ;;  %v236_v13 = vld [vmem:[%s325_s1 + $0x48] sm:$0xff]   ;;  %v238_v15 = vld [vmem:[%s325_s1 + $0x58] sm:$0xff]  }
   0x6   :  { %157 = vmatpush1.bf16.msra.mxu0 %v228_v2  ;;  %v239_v16 = vld [vmem:[%s325_s1 + $0x60] sm:$0xff]   ;;  %v240_v17 = vld [vmem:[%s325_s1 + $0x68] ss:$0 sps:$4 sm:$0xff]  }
   0x7   :  { %158 = vmatprep.subr.bf16.mxu0 %v244_v0  ;;  %v152_v18 = vsel %vm150_vm1, %v240_v17, 0  ;;  %v241_v19 = vld [vmem:[%s326_s0] ss:$8 sps:$4 sm:$0xff]  }
   0x9   :  { %53 = vperm.xlu0 %226, %v45_v8  }
   0xa   :  { %159 = vmatpush1.bf16.msra.mxu0 %v229_v3 }
   0xb   :  { %160 = vmatprep.subr.bf16.mxu0 %v244_v0 }
   0xe   :  { %161 = vmatpush1.bf16.msra.mxu0 %v230_v4 }
   0xf   :  { %162 = vmatprep.subr.bf16.mxu0 %v244_v0 }
  0x12   :  { %163 = vmatpush1.bf16.msra.mxu0 %v231_v5 }
  0x13   :  { %164 = vmatprep.subr.bf16.mxu0 %v244_v0 }
  0x16   :  { %165 = vmatpush1.bf16.msra.mxu0 %v232_v9 }
  0x17   :  { %166 = vmatprep.subr.bf16.mxu0 %v244_v0 }
  0x1a   :  { %167 = vmatpush1.bf16.msra.mxu0 %v233_v10 }
  0x1b   :  { %168 = vmatprep.subr.bf16.mxu0 %v244_v0 }
  0x1e   :  { %169 = vmatpush1.bf16.msra.mxu0 %v234_v11 }
  0x1f   :  { %170 = vmatprep.subr.bf16.mxu0 %v244_v0 }
  0x22   :  { %171 = vmatpush1.bf16.msra.mxu0 %v235_v12 }
  0x23   :  { %172 = vmatprep.subr.bf16.mxu0 %v244_v0 }
  0x26   :  { %173 = vmatpush1.bf16.msra.mxu0 %v236_v13 }
  0x27   :  { %174 = vmatprep.subr.bf16.mxu0 %v244_v0 }
  0x2a   :  { %175 = vmatpush1.bf16.msra.mxu0 %v237_v14 }
  0x2b   :  { %176 = vmatprep.subr.bf16.mxu0 %v244_v0 }
  0x2e   :  { %177 = vmatpush1.bf16.msra.mxu0 %v238_v15 }
  0x2f   :  { %178 = vmatprep.subr.bf16.mxu0 %v244_v0 }
  0x32   :  { %179 = vmatpush1.bf16.msra.mxu0 %v239_v16 }
  0x33   :  { %180 = vmatprep.subr.bf16.mxu0 %v244_v0 }
  0x36   :  { %181 = vmatpush1.bf16.msra.mxu0 %v152_v18 }
  0x39   :  { %187 = vmatmul.mubr.bf16.vlgmr.msra.gmra.mrb[0].mxu0 %v241_v19 }
  0x84   :  { %v49_v20 = vpop.permute.xlu0 %48 }
  0x88   :  { %v54_v24 = vpop.permute.xlu0 %53 }
 0x10c   :  { %v188_v21 = vpop.f32.mrb[0].mxu0 }
 0x10d   :  { %v189_v22 = vadd.f32 %v188_v21, %v49_v20  ;;  %v190_v23 = vpop.f32.mrb[1].mxu0 }
 0x10e   :  { %v191_v25 = vpop.f32.mrb[2].mxu0 }
 0x10f   :  { %vm195_vm2 = vcmp.gt.f32.partialorder %v189_v22, 0.0  ;;  %v197_v26 = vmul.f32 0.01, %v189_v22  ;;  %v192_v27 = vadd.f32 %v191_v25, %v54_v24  ;;  %v193_v28 = vpop.f32.mrb[3].mxu0 }
 0x111   :  { %v199_v29 = vsel %vm195_vm2, %v189_v22, %v197_v26  ;;  %vm196_vm4 = vcmp.gt.f32.partialorder %v192_v27, 0.0  ;;  %v198_v30 = vmul.f32 0.01, %v192_v27 }
 0x112   :  { %202 = vst.msk [vmem:[%s328_s3] sm:$0xff] %vm201_vm3, %v199_v29 }
 0x113   :  { %v200_v31 = vsel %vm196_vm4, %v192_v27, %v198_v30 }
 0x114   :  { %203 = vst.msk [vmem:[%s328_s3 + $0x8] sm:$0xff] %vm201_vm3, %v200_v31 }

// kernel: cae_bn3_forward.10
= control target key start
LH: loop header
LB: loop body
LE: loop exit
PB: predicated region body
PF: predicated region fallthrough
CT: control target
= control target key end

     0   :  { %vm56_vm0 = vcmask 130048   ;;  %v500_v3 = vmov 0   ;;  %vm161_vm1 = vcmask 261120   ;;  %vm265_vm2 = vcmask 254976   ;;  %s641_s0 = inlined_call_operand.vmem [shape: f32[16,2], index: 0, kind: input, shape index: {}]   ;;  %s642_s1 = inlined_call_operand.vmem [shape: f32[32,16], index: 1, kind: input, shape index: {}]   ;;  %s643_s2 = inlined_call_operand.vmem [shape: f32[32,1], index: 2, kind: input, shape index: {}]   ;;  %s644_s3 = inlined_call_operand.vmem [shape: f32[10,32], index: 3, kind: input, shape index: {}]   ;;  %s645_s5 = inlined_call_operand.vmem [shape: f32[16,1], index: 5, kind: input, shape index: {}]   ;;  %s646_s4 = inlined_call_operand.vmem [shape: f32[16,32], index: 4, kind: input, shape index: {}]   ;;  %s647_s6 = inlined_call_operand.vmem [shape: f32[32,2], index: 6, kind: output, shape index: {0}]   ;;  %s648_s8 = inlined_call_operand.vmem [shape: f32[16,2], index: 8, kind: output, shape index: {2}]   ;;  %s649_s7 = inlined_call_operand.vmem [shape: f32[10,2], index: 7, kind: output, shape index: {1}]  }
   0x1   :  { %v30_v0 = vld [vmem:[%s641_s0] sm:$0xff]  ;;  %v31_v1 = vld [vmem:[%s641_s0 + $0x8] sm:$0xff]  ;;  %492 = vset.pattern.permute.xlu0 %v500_v3  ;;  %493 = vset.pattern.permute.xlu1 %v500_v3  ;;  %v34_v6 = vld [vmem:[%s643_s2 + $0x10] sm:$0xff]  ;;  %vm154_vm3 = vcmask 15360   ;;  %vm284_vm6 = vcmask 9216  }
   0x2   :  { %v26_v2 = vld [vmem:[%s642_s1] sm:$0xff]  ;;  %v471_v4 = vpack.c.bf16 %v31_v1, %v30_v0  ;;  %v27_v7 = vld [vmem:[%s642_s1 + $0x8] sm:$0xff]  ;;  %48 = vperm.xlu1 %493, %v34_v6   ;;  %v28_v10 = vld [vmem:[%s642_s1 + $0x10] sm:$0xff] }
   0x3   :  { %443 = vmatprep.mubr.msk.f32.mxu0 %vm56_vm0, %v26_v2  ;;  %v32_v5 = vld [vmem:[%s643_s2] sm:$0xff]  ;;  %v33_v8 = vld [vmem:[%s643_s2 + $0x8] sm:$0xff]  ;;  %v35_v11 = vld [vmem:[%s643_s2 + $0x18] sm:$0xff] }
   0x4   :  { %472 = vmatprep.subr.bf16.mxu0 %v471_v4  ;;  %38 = vperm.xlu0 %492, %v32_v5   ;;  %v159_v9 = vld [vmem:[%s644_s3] sm:$0xff]  ;;  %v29_v12 = vld [vmem:[%s642_s1 + $0x18] sm:$0xff]  ;;  %v160_v14 = vld [vmem:[%s644_s3 + $0x8] sm:$0x3] }
   0x5   :  { %474 = vmatpush3.bf16.msra.mxu0 %v471_v4  ;;  %457 = vmatprep.mubr.msk.f32.mxu1 %vm161_vm1, %v159_v9  ;;  %v260_v13 = vmul.f32 %v159_v9, %v159_v9  ;;  %v261_v16 = vmul.f32 %v160_v14, %v160_v14  ;;  %v300_v18 = vld [vmem:[%s645_s5] sm:$0xff]  ;;  %v301_v19 = vld [vmem:[%s645_s5 + $0x8] sm:$0xff] }
   0x6   :  { %53 = vperm.xlu1 %493, %v35_v11   ;;  %v298_v20 = vld [vmem:[%s646_s4] sm:$0xff]  ;;  %v299_v44 = vld [vmem:[%s646_s4 + $0x8] sm:$0xff] }
   0x7   :  { %v262_v15 = vsel %vm161_vm1, %v260_v13, 0.0  ;;  %v266_v17 = vsel %vm265_vm2, %v261_v16, 0.0 }
   0x8   :  { %444 = vmatmul.mubr.msk.f32.vlgmr.msra.gmra.mrb[0].mxu0 %vm56_vm0, %v27_v7  ;;  %43 = vperm.xlu0 %492, %v33_v8  }
   0x9   :  { %446 = vmatprep.mubr.msk.f32.mxu0 %vm56_vm0, %v28_v10 }
   0xc   :  { %447 = vmatmul.mubr.msk.f32.gmra.mrb[2].mxu0 %vm56_vm0, %v29_v12 }
   0xd   :  { %468 = vmatprep.mubr.msk.f32.mxu0 %vm161_vm1, %v298_v20 }
  0x27   :  { %263 = vadd.xlane.f32.xlu0 %v262_v15 }
  0x2a   :  { %267 = vadd.xlane.f32.xlu1 %v266_v17 }
  0x3b   :  { %309 = vperm.xlu1 %493, %v301_v19  }
  0x3d   :  { %304 = vperm.xlu0 %492, %v300_v18  }
  0x81   :  { %v49_v22 = vpop.permute.xlu1 %48 }
  0x83   :  { %v39_v21 = vpop.permute.xlu0 %38 }
  0x85   :  { %v54_v29 = vpop.permute.xlu1 %53 }
  0x87   :  { %v44_v23 = vpop.permute.xlu0 %43 }
  0xb4   :  { %v264_v51 = vpop.xlane.xlu0 %263 }
  0xb7   :  { %v268_v52 = vpop.xlane.xlu1 %267 }
  0xbb   :  { %v310_v56 = vpop.permute.xlu1 %309 }
  0xbc   :  { %v305_v55 = vpop.permute.xlu0 %304 }
  0xdb   :  { %v445_v24 = vpop.f32.mrb[0].mxu0 }
  0xdc   :  { %v141_v25 = vadd.f32 %v445_v24, %v44_v23  ;;  %v135_v26 = vpop.f32.mrb[1].mxu0 }
  0xdd   :  { %v136_v27 = vadd.f32 %v135_v26, %v39_v21 }
  0xde   :  { %156 = vst.msk [vmem:[%s647_s6 + $0x8] sm:$0xff] %vm154_vm3, %v141_v25  ;;  %v244_v28 = vmul.f32 %v141_v25, %v141_v25 }
  0xdf   :  { %155 = vst.msk [vmem:[%s647_s6] sm:$0xff] %vm154_vm3, %v136_v27  ;;  %v475_v30 = vpack.c.bf16 %v141_v25, %v136_v27  ;;  %v243_v31 = vmul.f32 %v136_v27, %v136_v27  ;;  %v448_v32 = vpop.f32.mrb[2].mxu0 }
  0xe0   :  { %v248_v33 = vsel %vm154_vm3, %v244_v28, 0.0  ;;  %v151_v34 = vadd.f32 %v448_v32, %v54_v29  ;;  %v145_v35 = vpop.f32.mrb[3].mxu0 }
  0xe1   :  { %v247_v36 = vsel %vm154_vm3, %v243_v31, 0.0  ;;  %v146_v37 = vadd.f32 %v145_v35, %v49_v22  ;;  %476 = vmatprep.subr.bf16.mxu1 %v475_v30  ;;  %484 = vmatprep.subr.bf16.mxu0 %v475_v30 }
  0xe2   :  { %v249_v38 = vadd.f32 %v248_v33, %v247_v36  ;;  %158 = vst.msk [vmem:[%s647_s6 + $0x18] sm:$0xff] %vm154_vm3, %v151_v34  ;;  %478 = vmatpush3.bf16.msra.mxu1 %v475_v30  ;;  %486 = vmatpush3.bf16.msra.mxu0 %v475_v30  ;;  %v246_v39 = vmul.f32 %v151_v34, %v151_v34 }
  0xe3   :  { %157 = vst.msk [vmem:[%s647_s6 + $0x10] sm:$0xff] %vm154_vm3, %v146_v37  ;;  %v479_v40 = vpack.c.bf16 %v151_v34, %v146_v37  ;;  %v245_v41 = vmul.f32 %v146_v37, %v146_v37 }
  0xe4   :  { %v252_v45 = vsel %vm154_vm3, %v246_v39, 0.0 }
  0xe5   :  { %v250_v42 = vsel %vm154_vm3, %v245_v41, 0.0  ;;  %480 = vmatprep.subr.bf16.mxu1 %v479_v40  ;;  %488 = vmatprep.subr.bf16.mxu0 %v479_v40 }
  0xe6   :  { %v251_v43 = vadd.f32 %v250_v42, %v249_v38  ;;  %482 = vmatpush3.bf16.msra.mxu1 %v479_v40  ;;  %490 = vmatpush3.bf16.msra.mxu0 %v479_v40 }
  0xe8   :  { %v253_v46 = vadd.f32 %v252_v45, %v251_v43 }
  0xe9   :  { %458 = vmatmul.mubr.msk.f32.vlgmr.msra.gmra.mrb[0].mxu1 %vm161_vm1, %v160_v14  ;;  %469 = vmatmul.mubr.msk.f32.vlgmr.msra.gmra.mrb[4].mxu0 %vm161_vm1, %v299_v44 }
  0xea   :  { %v254_v47 = vrot.slane %v253_v46, 4 }
  0xec   :  { %v255_v48 = vadd.f32 %v254_v47, %v253_v46 }
  0xee   :  { %v256_v49 = vrot.slane %v255_v48, 2 }
  0xf0   :  { %v257_v50 = vadd.f32 %v256_v49, %v255_v48 }
  0xf2   :  { %v258_v53 = vrot.slane %v257_v50, 1 }
  0xf4   :  { %v259_v54 = vadd.f32 %v258_v53, %v257_v50 }
  0xf6   :  { %v270_v59 = vadd.f32 %v268_v52, %v259_v54  ;;  %v269_v0 = vadd.f32 %v264_v51, %v259_v54 }
 0x1bc   :  { %v459_v57 = vpop.f32.mrb[0].mxu1  ;;  %v470_v58 = vpop.f32.mrb[4].mxu0 }
 0x1bd   :  { %v272_v60 = vmul.f32 2.0, %v459_v57  ;;  %v390_v61 = vadd.f32 %v470_v58, %v310_v56  ;;  %v234_v62 = vpop.f32.mrb[1].mxu1  ;;  %v384_v63 = vpop.f32.mrb[5].mxu0 }
 0x1be   :  { %v271_v1 = vmul.f32 2.0, %v234_v62  ;;  %v385_v2 = vadd.f32 %v384_v63, %v305_v55 }
 0x1bf   :  { %v274_v3 = vsub.f32 %v270_v59, %v272_v60  ;;  %vm394_vm4 = vcmp.gt.f32.partialorder %v390_v61, 0.0  ;;  %v396_v4 = vmul.f32 0.01, %v390_v61 }
 0x1c0   :  { %v273_v5 = vsub.f32 %v269_v0, %v271_v1  ;;  %vm393_vm5 = vcmp.gt.f32.partialorder %v385_v2, 0.0  ;;  %v395_v6 = vmul.f32 0.01, %v385_v2 }
 0x1c1   :  { %v276_v7 = vmax.f32 %v274_v3, 0.0  ;;  %v398_v8 = vsel %vm394_vm4, %v390_v61, %v396_v4 }
 0x1c2   :  { %400 = vst.msk [vmem:[%s648_s8 + $0x8] sm:$0xff] %vm154_vm3, %v398_v8  ;;  %v275_v9 = vmax.f32 %v273_v5, 0.0  ;;  %v397_v10 = vsel %vm393_vm5, %v385_v2, %v395_v6 }
 0x1c3   :  { %v278_v11 = vadd.f32 1.0, %v276_v7  ;;  %399 = vst.msk [vmem:[%s648_s8] sm:$0xff] %vm154_vm3, %v397_v10 }
 0x1c4   :  { %v277_v12 = vadd.f32 1.0, %v275_v9 }
 0x1c5   :  { %494 = vrcp.f32 %v278_v11 }
 0x1c6   :  { %496 = vrcp.f32 %v277_v12 }
 0x1cf   :  { %v495_v13 = vpop.eup %494 }
 0x1d0   :  { %v497_v14 = vpop.eup %496  ;;  %v285_v15 = vsel %vm284_vm6, %v495_v13, 0.0 }
 0x1d1   :  { %v283_v16 = vsel %vm154_vm3, %v497_v14, 0.0 }
 0x1d2   :  { %v286_v17 = vadd.f32 %v285_v15, %v283_v16 }
 0x1d4   :  { %v287_v18 = vrot.slane %v286_v17, 4 }
 0x1d6   :  { %v288_v19 = vadd.f32 %v287_v18, %v286_v17 }
 0x1d8   :  { %v289_v20 = vrot.slane %v288_v19, 2 }
 0x1da   :  { %v290_v21 = vadd.f32 %v289_v20, %v288_v19 }
 0x1dc   :  { %v291_v22 = vrot.slane %v290_v21, 1 }
 0x1de   :  { %v292_v23 = vadd.f32 %v291_v22, %v290_v21 }
 0x1e0   :  { %498 = vrcp.f32 %v292_v23 }
 0x1ea   :  { %v499_v24 = vpop.eup %498 }
 0x1eb   :  { %v294_v25 = vmul.f32 %v499_v24, %v497_v14  ;;  %v295_v26 = vmul.f32 %v499_v24, %v495_v13 }
 0x1ed   :  { %296 = vst.msk [vmem:[%s649_s7] sm:$0xff] %vm154_vm3, %v294_v25 }
 0x1ee   :  { %297 = vst.msk [vmem:[%s649_s7 + $0x8] sm:$0x3] %vm284_vm6, %v295_v26 }

// kernel: cae_bn3_forward.11
= control target key start
LH: loop header
LB: loop body
LE: loop exit
PB: predicated region body
PF: predicated region fallthrough
CT: control target
= control target key end

     0   :  { %s653_s18 = smov 0   ;;  %s655_s19 = smov 0   ;;  %s722_s0 = inlined_call_operand.vmem [shape: bf16[8,8,128], index: 0, kind: input, shape index: {}]   ;;  %s723_s1 = inlined_call_operand.vmem [shape: bf16[8,128,16], index: 1, kind: input, shape index: {}]   ;;  %s724_s2 = inlined_call_operand.vmem [shape: f32[8,1], index: 2, kind: input, shape index: {}]   ;;  %s725_s3 = inlined_call_operand.vmem [shape: f32[8,8,16], index: 3, kind: output, shape index: {0}]   ;;  %s726_s4 = inlined_call_operand.vmem [shape: f32[8,1], index: 4, kind: output, shape index: {1}]   ;;  %s727_s5 = inlined_call_operand.vmem [shape: f32[8,1], index: 5, kind: output, shape index: {2}]  }
   0x1   :  { %s657_s20 = smov 0  }
   0x2 LB: > { %s28_s21 = sadd.s32 1, %s613_s19  ;;  %p511_p0 = scmp.ge.s32.totalorder %s617_s20, 1  ;;  %s617_s20 = sphi %s657_s20, %s16_s20   ;;  %s613_s19 = sphi %s655_s19, %s729_s19   ;;  %s609_s18 = sphi %s653_s18, %s728_s18  }
   0x3   : > { %p30_p1 = scmp.ge.s32.totalorder %s28_s21, 8  ;;  %p210_p2 = scmp.lt.s32.totalorder %s617_s20, 9 }
   0x5   : > { %s731_s21 = smov (%p30_p1, %s28_s21), 0  ;;  %p211_p3 = pnand %p511_p0, %p210_p2 }
   0x6   : > { %p247_p4 = scmp.lt.s32.totalorder (!%p211_p3), %s609_s18, 7  ;;  %v284_v0 = vld [vmem:[%s724_s2] sm:$0xff] (!%p211_p3)  ;;  %v619_v1 = vmov (!%p211_p3), 0.0   ;;  %vm620_vm0 = vmmov (!%p211_p3), 0   ;;  %v621_v2 = vmov (!%p211_p3), 0   ;;  %p383_p5 = scmp.eq.s32.totalorder (!%p211_p3), %s609_s18, 0 }
   0x7   : > { %214 = sbr.rel (%p211_p3) target bundleno = 418 (0x1a2), region = 32  ;;  %538 = vmatprep.subr.bf16.mxu0 (!%p211_p3), %v619_v1  ;;  %554 = vmatprep.mubr.msk.bf16.mxu0 (!%p211_p3), %vm620_vm0, %v619_v1  ;;  %vm381_vm2 = vcmask (!%p211_p3), 130048  }
   0x8   : > { %586 = vset.pattern.permute.xlu0 (!%p211_p3), %v621_v2 }
   0x9   : > { %287 = vperm.xlu0 (!%p211_p3), %586, %v284_v0  }
   0xe   : > { %s678_s24 = scalar_select %p247_p4, %s609_s18, 7 }
   0xf   : > { %vm389_vm3 = vcmask (%p383_p5), 7168   ;;  %v622_v20 = vmov (%p383_p5), 0.0  }
  0x10   : > { %s527_s25 = sshll.u32 %s678_s24, 6  ;;  %s512_s29 = sshll.u32 %s678_s24, 2  ;;  %390 = vst.msk [vmem:[%s726_s4] sm:$0xff] (%p383_p5), %vm389_vm3, %v622_v20  ;;  %391 = vst.msk [vmem:[%s727_s5] sm:$0xff] (%p383_p5), %vm389_vm3, %v622_v20 }
  0x11   : > { %s258_s28 = scalar_lea.vmem %s723_s1, %s527_s25  ;;  %s250_s7 = scalar_lea.vmem %s722_s0, %s512_s29 }
  0x12   : > { %v587_v3 = vld [vmem:[%s258_s28] sm:$0xff]   ;;  %v588_v4 = vld [vmem:[%s258_s28 + $0x8] sm:$0xff]   ;;  %v589_v5 = vld [vmem:[%s258_s28 + $0x10] sm:$0xff]   ;;  %s515_s8 = sshll.u32 %s678_s24, 3 }
  0x13   : > { %539 = vmatpush3.bf16.msra.mxu0 %v587_v3  ;;  %v590_v6 = vld [vmem:[%s258_s28 + $0x18] sm:$0xff]   ;;  %v591_v7 = vld [vmem:[%s258_s28 + $0x20] sm:$0xff]   ;;  %v592_v8 = vld [vmem:[%s258_s28 + $0x28] sm:$0xff]   ;;  %s265_s11 = scalar_lea.vmem %s725_s3, %s515_s8 }
  0x14   : > { %540 = vmatprep.subr.bf16.mxu0 %v619_v1  ;;  %v593_v9 = vld [vmem:[%s258_s28 + $0x30] sm:$0xff]   ;;  %v594_v10 = vld [vmem:[%s258_s28 + $0x38] sm:$0xff]   ;;  %v267_v11 = vld [vmem:[%s250_s7] sm:$0xf] }
  0x17   : > { %541 = vmatpush3.bf16.msra.mxu0 %v588_v4 }
  0x18   : > { %542 = vmatprep.subr.bf16.mxu0 %v619_v1 }
  0x1b   : > { %543 = vmatpush3.bf16.msra.mxu0 %v589_v5 }
  0x1c   : > { %544 = vmatprep.subr.bf16.mxu0 %v619_v1 }
  0x1f   : > { %545 = vmatpush3.bf16.msra.mxu0 %v590_v6 }
  0x20   : > { %546 = vmatprep.subr.bf16.mxu0 %v619_v1 }
  0x23   : > { %547 = vmatpush3.bf16.msra.mxu0 %v591_v7 }
  0x24   : > { %548 = vmatprep.subr.bf16.mxu0 %v619_v1 }
  0x27   : > { %549 = vmatpush3.bf16.msra.mxu0 %v592_v8 }
  0x28   : > { %550 = vmatprep.subr.bf16.mxu0 %v619_v1 }
  0x2b   : > { %551 = vmatpush3.bf16.msra.mxu0 %v593_v9 }
  0x2c   : > { %552 = vmatprep.subr.bf16.mxu0 %v619_v1 }
  0x2f   : > { %553 = vmatpush3.bf16.msra.mxu0 %v594_v10 }
  0x32   : > { %555 = vmatmul.mubr.bf16.vlgmr.msra.gmra.mrb[0].mxu0 %v267_v11 }
  0x88   : > { %v288_v12 = vpop.permute.xlu0 %287 }
 0x105   : > { %v372_v13 = vpop.f32.mrb[0].mxu0  ;;  %388 = sbr.rel (!%p383_p5) target bundleno = 268 (0x10c), region = 36 }
 0x106   : > { %v373_v14 = vadd.f32 %v372_v13, %v288_v12  ;;  %v556_v15 = vpop.f32.mrb[1].mxu0 }
 0x107   : > { %v375_v16 = vpop.f32.mrb[2].mxu0 }
 0x108   : > { %vm378_vm1 = vcmp.gt.f32.partialorder %v373_v14, 0.0  ;;  %v379_v17 = vmul.f32 0.01, %v373_v14  ;;  %v557_v18 = vpop.f32.mrb[3].mxu0 }
 0x10a   : > { %v380_v19 = vsel %vm378_vm1, %v373_v14, %v379_v17 }
 0x10b   : > { %382 = vst.msk [vmem:[%s265_s11] sm:$0xff] %vm381_vm2, %v380_v19 }
 0x10c PF: > { %v393_v21 = vsel %vm381_vm2, %v380_v19, 0.0  ;;  %v400_v22 = vmul.f32 %v380_v19, %v380_v19  ;;  %v392_v24 = vld [vmem:[%s726_s4] sm:$0xff]  ;;  %vm397_vm4 = vcmask 7168  }
 0x10d   : > { %394 = vadd.xlane.f32.xlu0 %v393_v21  ;;  %v399_v27 = vld [vmem:[%s727_s5] sm:$0xff] }
 0x10e   : > { %v401_v23 = vsel %vm381_vm2, %v400_v22, 0.0 }
 0x111   : > { %402 = vadd.xlane.f32.xlu0 %v401_v23 }
 0x19a   : > { %v395_v25 = vpop.xlane.xlu0 %394 }
 0x19b   : > { %v396_v26 = vadd.f32 %v395_v25, %v392_v24 }
 0x19d   : > { %398 = vst.msk [vmem:[%s726_s4] sm:$0xff] %vm397_vm4, %v396_v26 }
 0x19e   : > { %v403_v28 = vpop.xlane.xlu0 %402 }
 0x19f   : > { %v404_v29 = vadd.f32 %v403_v28, %v399_v27 }
 0x1a1   : > { %405 = vst.msk [vmem:[%s727_s5] sm:$0xff] %vm397_vm4, %v404_v29 }
 0x1a2 PF: > { %s16_s20 = sadd.s32 1, %s617_s20   ;;  %s728_s18 = smov %s613_s19 }
 0x1a3   : > { %p13_p6 = scmp.ge.s32.totalorder %s16_s20, 10   ;;  %s729_s19 = smov %s731_s21 }
 0x1a5   :  { %15 = sbr.rel (!%p13_p6) target bundleno = 2 (0x2), region = 85 }

// kernel: cae_bn3_forward.12
= control target key start
LH: loop header
LB: loop body
LE: loop exit
PB: predicated region body
PF: predicated region fallthrough
CT: control target
= control target key end

     0   :  { %s699_s18 = smov 0   ;;  %s701_s19 = smov 0   ;;  %s788_s0 = inlined_call_operand.vmem [shape: bf16[8,4,216], index: 0, kind: input, shape index: {}]   ;;  %s789_s1 = inlined_call_operand.vmem [shape: bf16[8,216,128], index: 1, kind: input, shape index: {}]   ;;  %s790_s2 = inlined_call_operand.vmem [shape: f32[4,1], index: 2, kind: input, shape index: {}]   ;;  %s791_s3 = inlined_call_operand.vmem [shape: f32[8,4,128], index: 3, kind: output, shape index: {0}]   ;;  %s792_s4 = inlined_call_operand.vmem [shape: f32[4,1], index: 4, kind: output, shape index: {1}]   ;;  %s793_s5 = inlined_call_operand.vmem [shape: f32[4,1], index: 5, kind: output, shape index: {2}]  }
   0x1   :  { %s703_s20 = smov 0  }
   0x2 LB: > { %s28_s21 = sadd.s32 1, %s661_s19  ;;  %p575_p0 = scmp.ge.s32.totalorder %s665_s20, 1  ;;  %s665_s20 = sphi %s703_s20, %s16_s20   ;;  %s661_s19 = sphi %s701_s19, %s795_s19   ;;  %s657_s18 = sphi %s699_s18, %s794_s18  }
   0x3   : > { %p30_p1 = scmp.ge.s32.totalorder %s28_s21, 8  ;;  %p211_p2 = scmp.lt.s32.totalorder %s665_s20, 9 }
   0x5   : > { %s797_s21 = smov (%p30_p1, %s28_s21), 0  ;;  %p212_p3 = pnand %p575_p0, %p211_p2 }
   0x6   : > { %p249_p4 = scmp.lt.s32.totalorder (!%p212_p3), %s657_s18, 7  ;;  %v298_v0 = vld [vmem:[%s790_s2] sm:$0xf] (!%p212_p3)  ;;  %v667_v1 = vmov (!%p212_p3), 0   ;;  %vm395_vm0 = vcmask (!%p212_p3), 719872   ;;  %vm399_vm1 = vcmask (!%p212_p3), 1043456  }
   0x7   : > { %215 = sbr.rel (%p212_p3) target bundleno = 443 (0x1bb), region = 32  ;;  %403 = vmatprep.subr.bf16.mxu0 (!%p212_p3), %v667_v1  ;;  %628 = vset.pattern.permute.xlu0 (!%p212_p3), %v667_v1  ;;  %p447_p5 = scmp.eq.s32.totalorder (!%p212_p3), %s657_s18, 0 }
   0x8   : > { %301 = vperm.xlu0 (!%p212_p3), %628, %v298_v0  }
   0xe   : > { %s724_s24 = scalar_select %p249_p4, %s657_s18, 7 }
   0xf   : > { %vm453_vm3 = vcmask (%p447_p5), 3072   ;;  %v668_v27 = vmov (%p447_p5), 0.0  }
  0x10   : > { %s601_s25 = smul.u32 108, %s724_s24  ;;  %s599_s26 = sshll.u32 %s724_s24, 2  ;;  %454 = vst.msk [vmem:[%s792_s4] sm:$0xf] (%p447_p5), %vm453_vm3, %v668_v27  ;;  %455 = vst.msk [vmem:[%s793_s5] sm:$0xf] (%p447_p5), %vm453_vm3, %v668_v27 }
  0x11   : > { %s253_s29 = scalar_lea.vmem %s788_s0, %s599_s26  ;;  %s268_s10 = scalar_lea.vmem %s791_s3, %s599_s26 }
  0x12   : > { %s736_s7 = scalar_lea.vmem %s789_s1, %s601_s25  ;;  %v580_v2 = vld.sshfl [vmem:[%s253_s29] sm:$0x33 pattern:$0x76325410] }
  0x13   : > { %v629_v3 = vld [vmem:[%s736_s7] sm:$0xff]   ;;  %v312_v4 = vcombine.high %v580_v2, %v580_v2  ;;  %v630_v5 = vld [vmem:[%s736_s7 + $0x8] sm:$0xff]   ;;  %v631_v6 = vld [vmem:[%s736_s7 + $0x10] sm:$0xff]  }
  0x14   : > { %404 = vmatpush1.bf16.msra.mxu0 %v629_v3  ;;  %v632_v7 = vld [vmem:[%s736_s7 + $0x18] sm:$0xff]   ;;  %v633_v8 = vld [vmem:[%s736_s7 + $0x20] sm:$0xff]   ;;  %v634_v9 = vld [vmem:[%s736_s7 + $0x28] sm:$0xff]  }
  0x15   : > { %595 = vmatprep.mubr.msk.bf16.mxu0 %vm395_vm0, %v312_v4  ;;  %405 = vmatprep.subr.bf16.mxu0 %v667_v1  ;;  %v635_v10 = vld [vmem:[%s736_s7 + $0x30] sm:$0xff]   ;;  %v636_v11 = vld [vmem:[%s736_s7 + $0x38] sm:$0xff]   ;;  %v637_v12 = vld [vmem:[%s736_s7 + $0x40] sm:$0xff]  }
  0x16   : > { %v638_v13 = vld [vmem:[%s736_s7 + $0x48] sm:$0xff]   ;;  %v639_v14 = vld [vmem:[%s736_s7 + $0x50] sm:$0xff]   ;;  %v640_v15 = vld [vmem:[%s736_s7 + $0x58] sm:$0xff]  }
  0x17   : > { %v641_v16 = vld [vmem:[%s736_s7 + $0x60] sm:$0xff]   ;;  %v642_v17 = vld [vmem:[%s736_s7 + $0x68] ss:$0 sps:$4 sm:$0xff]  }
  0x18   : > { %406 = vmatpush1.bf16.msra.mxu0 %v630_v5  ;;  %v401_v18 = vsel %vm399_vm1, %v642_v17, 0 }
  0x19   : > { %407 = vmatprep.subr.bf16.mxu0 %v667_v1 }
  0x1c   : > { %408 = vmatpush1.bf16.msra.mxu0 %v631_v6 }
  0x1d   : > { %409 = vmatprep.subr.bf16.mxu0 %v667_v1 }
  0x20   : > { %410 = vmatpush1.bf16.msra.mxu0 %v632_v7 }
  0x21   : > { %411 = vmatprep.subr.bf16.mxu0 %v667_v1 }
  0x24   : > { %412 = vmatpush1.bf16.msra.mxu0 %v633_v8 }
  0x25   : > { %413 = vmatprep.subr.bf16.mxu0 %v667_v1 }
  0x28   : > { %414 = vmatpush1.bf16.msra.mxu0 %v634_v9 }
  0x29   : > { %415 = vmatprep.subr.bf16.mxu0 %v667_v1 }
  0x2c   : > { %416 = vmatpush1.bf16.msra.mxu0 %v635_v10 }
  0x2d   : > { %417 = vmatprep.subr.bf16.mxu0 %v667_v1 }
  0x30   : > { %418 = vmatpush1.bf16.msra.mxu0 %v636_v11 }
  0x31   : > { %419 = vmatprep.subr.bf16.mxu0 %v667_v1 }
  0x34   : > { %420 = vmatpush1.bf16.msra.mxu0 %v637_v12 }
  0x35   : > { %421 = vmatprep.subr.bf16.mxu0 %v667_v1 }
  0x38   : > { %422 = vmatpush1.bf16.msra.mxu0 %v638_v13 }
  0x39   : > { %423 = vmatprep.subr.bf16.mxu0 %v667_v1 }
  0x3c   : > { %424 = vmatpush1.bf16.msra.mxu0 %v639_v14 }
  0x3d   : > { %425 = vmatprep.subr.bf16.mxu0 %v667_v1 }
  0x40   : > { %426 = vmatpush1.bf16.msra.mxu0 %v640_v15 }
  0x41   : > { %427 = vmatprep.subr.bf16.mxu0 %v667_v1 }
  0x44   : > { %428 = vmatpush1.bf16.msra.mxu0 %v641_v16 }
  0x45   : > { %429 = vmatprep.subr.bf16.mxu0 %v667_v1 }
  0x48   : > { %430 = vmatpush1.bf16.msra.mxu0 %v401_v18 }
  0x4b   : > { %436 = vmatmul.mubr.bf16.vlgmr.msra.gmra.mrb[0].mxu0 %v580_v2 }
  0x87   : > { %v302_v19 = vpop.permute.xlu0 %301 }
 0x11e   : > { %v437_v20 = vpop.f32.mrb[0].mxu0  ;;  %452 = sbr.rel (!%p447_p5) target bundleno = 293 (0x125), region = 36 }
 0x11f   : > { %v438_v21 = vadd.f32 %v437_v20, %v302_v19  ;;  %v439_v22 = vpop.f32.mrb[1].mxu0 }
 0x120   : > { %v440_v23 = vpop.f32.mrb[2].mxu0 }
 0x121   : > { %vm443_vm2 = vcmp.gt.f32.partialorder %v438_v21, 0.0  ;;  %v444_v24 = vmul.f32 0.01, %v438_v21  ;;  %v441_v25 = vpop.f32.mrb[3].mxu0 }
 0x123   : > { %v445_v26 = vsel %vm443_vm2, %v438_v21, %v444_v24 }
 0x124   : > { %446 = vst [vmem:[%s268_s10] sm:$0xf] %v445_v26 }
 0x125 PF: > { %v457_v28 = vsel %vm399_vm1, %v445_v26, 0.0  ;;  %v464_v29 = vmul.f32 %v445_v26, %v445_v26  ;;  %v456_v31 = vld [vmem:[%s792_s4] sm:$0xf]  ;;  %vm461_vm4 = vcmask 3072  }
 0x126   : > { %458 = vadd.xlane.f32.xlu0 %v457_v28  ;;  %v463_v34 = vld [vmem:[%s793_s5] sm:$0xf] }
 0x127   : > { %v465_v30 = vsel %vm399_vm1, %v464_v29, 0.0 }
 0x12a   : > { %466 = vadd.xlane.f32.xlu0 %v465_v30 }
 0x1b3   : > { %v459_v32 = vpop.xlane.xlu0 %458 }
 0x1b4   : > { %v460_v33 = vadd.f32 %v459_v32, %v456_v31 }
 0x1b6   : > { %462 = vst.msk [vmem:[%s792_s4] sm:$0xf] %vm461_vm4, %v460_v33 }
 0x1b7   : > { %v467_v35 = vpop.xlane.xlu0 %466 }
 0x1b8   : > { %v468_v36 = vadd.f32 %v467_v35, %v463_v34 }
 0x1ba   : > { %469 = vst.msk [vmem:[%s793_s5] sm:$0xf] %vm461_vm4, %v468_v36 }
 0x1bb PF: > { %s16_s20 = sadd.s32 1, %s665_s20   ;;  %s794_s18 = smov %s661_s19 }
 0x1bc   : > { %p13_p6 = scmp.ge.s32.totalorder %s16_s20, 10   ;;  %s795_s19 = smov %s797_s21 }
 0x1be   :  { %15 = sbr.rel (!%p13_p6) target bundleno = 2 (0x2), region = 85 }

// kernel: cae_bn3_forward.13
= control target key start
LH: loop header
LB: loop body
LE: loop exit
PB: predicated region body
PF: predicated region fallthrough
CT: control target
= control target key end

     0   :  { %s1107_s0 = inlined_call_operand.vmem [shape: bf16[8,1,108], index: 0, kind: input, shape index: {}]   ;;  %s1108_s1 = inlined_call_operand.vmem [shape: bf16[8,108,1024], index: 1, kind: input, shape index: {}]   ;;  %s1109_s2 = inlined_call_operand.<no memory space> [shape: f32[1,1], index: 2, kind: input, shape index: {}]   ;;  %s1110_s3 = inlined_call_operand.vmem [shape: f32[8,1,1024], index: 3, kind: output, shape index: {}]  }
   0x1   :  { %v8_v0 = vstv %s1109_s2 }
   0x2   :  { %9 = vst [vmem:[#allocation2] sm:$0x1] %v8_v0 }
   0x3   :  { %s920_s14 = smov 0   ;;  %s922_s15 = smov 0  }
   0x4   :  { %s924_s16 = smov 0   ;;  %s926_s17 = smov 0  }
   0x5   :  { %s928_s18 = smov 0   ;;  %s930_s19 = smov 0  }
   0x6   :  { %s932_s20 = smov 0  }
   0x7 LB: > { %s24_s2 = sadd.s32 1, %s885_s18  ;;  %s27_s21 = sadd.s32 1, %s889_s19  ;;  %s893_s20 = sphi %s932_s20, %s15_s20   ;;  %s889_s19 = sphi %s930_s19, %s1116_s19   ;;  %s885_s18 = sphi %s928_s18, %s1115_s18   ;;  %s881_s17 = sphi %s926_s17, %s1114_s17   ;;  %s877_s16 = sphi %s924_s16, %s1113_s16   ;;  %s873_s15 = sphi %s922_s15, %s1112_s15   ;;  %s869_s14 = sphi %s920_s14, %s1111_s14  }
   0x8   : > { %p25_p0 = scmp.ge.s32.totalorder %s24_s2, 2  ;;  %p69_p1 = scmp.ne.s32.totalorder %s873_s15, %s869_s14 }
   0x9   : > { %p70_p2 = scmp.eq.s32.totalorder %s893_s20, 0  ;;  %s62_s25 = sadd.s32 1, %s873_s15 }
   0xa   : > { %s1118_s2 = smov (%p25_p0, %s24_s2), 0  ;;  %s1120_s21 = smov (!%p25_p0, %s27_s21), %s889_s19 }
   0xb   : > { %p71_p3 = por %p70_p2, %p69_p1  ;;  %p29_p4 = scmp.ge.s32.totalorder %s1120_s21, 8 }
   0xc   : > { %s58_s22 = ssub.s32 %s885_s18, %s1118_s2  ;;  %p695_p6 = scmp.ge.s32.totalorder %s893_s20, 16 }
   0xd   : > { %s1122_s21 = smov (%p29_p4, %s1120_s21), 0 }
   0xe   : > { %s57_s23 = ssub.s32 %s889_s19, %s1122_s21  ;;  %147 = sbr.rel (%p695_p6) target bundleno = 43 (0x2b), region = 20 }
   0xf   : > { %s59_s24 = sor.u32 %s58_s22, %s57_s23 }
  0x10   : > { %p60_p5 = scmp.eq.s32.totalorder %s59_s24, 0 }
  0x12   : > { %s971_s26 = scalar_select %p60_p5, %s873_s15, %s62_s25  }
  0x15   : > { %156 = sbr.rel (!%p71_p3) target bundleno = 43 (0x2b), region = 28  ;;  %s158_s27 = sand.u32 (%p71_p3), 1, %s873_s15  }
  0x16   : > { %s735_s28 = smul.u32 (%p71_p3), 224, %s158_s27  ;;  %s696_s29 = sshll.u32 (%p71_p3), %s885_s18, 2 }
  0x17   : > { %s736_s30 = smul.u32 (%p71_p3), 112, %s889_s19 }
  0x18   : > { %s985_s9 = scalar_lea.vmem (%p71_p3), [#allocation3], %s735_s28 }
  0x19   : > { %s163_s4 = sadd.s32 (%p71_p3), %s736_s30, %s696_s29 }
  0x1a   : > { %s697_s5 = sshll.u32 (%p71_p3), %s163_s4, 2 }
  0x1b   : > { %s980_s8 = scalar_lea.vmem (%p71_p3), %s1108_s1, %s697_s5 }
  0x1c   : > { %v178_v1 = vld [vmem:[%s980_s8] sm:$0xff]  ;;  %v180_v2 = vld [vmem:[%s980_s8 + $0x8] sm:$0xff] }
  0x1d   : > { %v182_v3 = vld [vmem:[%s980_s8 + $0x20] sm:$0xff]  ;;  %179 = vst [vmem:[%s985_s9] sm:$0xff] %v178_v1  ;;  %181 = vst [vmem:[%s985_s9 + $0x8] sm:$0xff] %v180_v2  ;;  %v184_v4 = vld [vmem:[%s980_s8 + $0x28] sm:$0xff] }
  0x1e   : > { %183 = vst [vmem:[%s985_s9 + $0x10] sm:$0xff] %v182_v3  ;;  %v186_v5 = vld [vmem:[%s980_s8 + $0x40] sm:$0xff]  ;;  %v188_v6 = vld [vmem:[%s980_s8 + $0x48] sm:$0xff]  ;;  %185 = vst [vmem:[%s985_s9 + $0x18] sm:$0xff] %v184_v4 }
  0x1f   : > { %187 = vst [vmem:[%s985_s9 + $0x20] sm:$0xff] %v186_v5  ;;  %189 = vst [vmem:[%s985_s9 + $0x28] sm:$0xff] %v188_v6  ;;  %v190_v7 = vld [vmem:[%s980_s8 + $0x60] sm:$0xff]  ;;  %v192_v8 = vld [vmem:[%s980_s8 + $0x68] sm:$0xff] }
  0x20   : > { %v194_v9 = vld [vmem:[%s980_s8 + $0x80] sm:$0xff]  ;;  %191 = vst [vmem:[%s985_s9 + $0x30] sm:$0xff] %v190_v7  ;;  %193 = vst [vmem:[%s985_s9 + $0x38] sm:$0xff] %v192_v8  ;;  %v196_v10 = vld [vmem:[%s980_s8 + $0x88] sm:$0xff] }
  0x21   : > { %195 = vst [vmem:[%s985_s9 + $0x40] sm:$0xff] %v194_v9  ;;  %v198_v11 = vld [vmem:[%s980_s8 + $0xa0] sm:$0xff]  ;;  %v200_v12 = vld [vmem:[%s980_s8 + $0xa8] sm:$0xff]  ;;  %197 = vst [vmem:[%s985_s9 + $0x48] sm:$0xff] %v196_v10 }
  0x22   : > { %199 = vst [vmem:[%s985_s9 + $0x50] sm:$0xff] %v198_v11  ;;  %201 = vst [vmem:[%s985_s9 + $0x58] sm:$0xff] %v200_v12  ;;  %v202_v13 = vld [vmem:[%s980_s8 + $0xc0] sm:$0xff]  ;;  %v204_v14 = vld [vmem:[%s980_s8 + $0xc8] sm:$0xff] }
  0x23   : > { %v206_v15 = vld [vmem:[%s980_s8 + $0xe0] sm:$0xff]  ;;  %203 = vst [vmem:[%s985_s9 + $0x60] sm:$0xff] %v202_v13  ;;  %205 = vst [vmem:[%s985_s9 + $0x68] sm:$0xff] %v204_v14  ;;  %v208_v16 = vld [vmem:[%s980_s8 + $0xe8] sm:$0xff] }
  0x24   : > { %207 = vst [vmem:[%s985_s9 + $0x70] sm:$0xff] %v206_v15  ;;  %v210_v17 = vld [vmem:[%s980_s8 + $0x100] sm:$0xff]  ;;  %v212_v18 = vld [vmem:[%s980_s8 + $0x108] sm:$0xff]  ;;  %209 = vst [vmem:[%s985_s9 + $0x78] sm:$0xff] %v208_v16 }
  0x25   : > { %211 = vst [vmem:[%s985_s9 + $0x80] sm:$0xff] %v210_v17  ;;  %213 = vst [vmem:[%s985_s9 + $0x88] sm:$0xff] %v212_v18  ;;  %v214_v19 = vld [vmem:[%s980_s8 + $0x120] sm:$0xff]  ;;  %v216_v20 = vld [vmem:[%s980_s8 + $0x128] sm:$0xff] }
  0x26   : > { %v218_v21 = vld [vmem:[%s980_s8 + $0x140] sm:$0xff]  ;;  %215 = vst [vmem:[%s985_s9 + $0x90] sm:$0xff] %v214_v19  ;;  %217 = vst [vmem:[%s985_s9 + $0x98] sm:$0xff] %v216_v20  ;;  %v220_v22 = vld [vmem:[%s980_s8 + $0x148] sm:$0xff] }
  0x27   : > { %219 = vst [vmem:[%s985_s9 + $0xa0] sm:$0xff] %v218_v21  ;;  %v222_v23 = vld [vmem:[%s980_s8 + $0x160] sm:$0xff]  ;;  %v224_v24 = vld [vmem:[%s980_s8 + $0x168] sm:$0xff]  ;;  %221 = vst [vmem:[%s985_s9 + $0xa8] sm:$0xff] %v220_v22 }
  0x28   : > { %223 = vst [vmem:[%s985_s9 + $0xb0] sm:$0xff] %v222_v23  ;;  %225 = vst [vmem:[%s985_s9 + $0xb8] sm:$0xff] %v224_v24  ;;  %v226_v25 = vld [vmem:[%s980_s8 + $0x180] sm:$0xff]  ;;  %v228_v26 = vld [vmem:[%s980_s8 + $0x188] sm:$0xff] }
  0x29   : > { %v230_v27 = vld [vmem:[%s980_s8 + $0x1a0] sm:$0xff]  ;;  %227 = vst [vmem:[%s985_s9 + $0xc0] sm:$0xff] %v226_v25  ;;  %229 = vst [vmem:[%s985_s9 + $0xc8] sm:$0xff] %v228_v26  ;;  %v232_v28 = vld [vmem:[%s980_s8 + $0x1a8] sm:$0xff] }
  0x2a   : > { %231 = vst [vmem:[%s985_s9 + $0xd0] sm:$0xff] %v230_v27  ;;  %233 = vst [vmem:[%s985_s9 + $0xd8] sm:$0xff] %v232_v28 }
  0x2b PF: > { %p698_p7 = scmp.ge.s32.totalorder %s893_s20, 1  ;;  %p238_p8 = scmp.lt.s32.totalorder %s893_s20, 17 }
  0x2d   : > { %p239_p9 = pnand %p698_p7, %p238_p8 }
  0x2e   : > { %s245_s10 = sand.u32 (!%p239_p9), 1, %s869_s14   ;;  %v895_v29 = vmov (!%p239_p9), 0   ;;  %v317_v30 = vld [vmem:[#allocation2] sm:$0x1] (!%p239_p9)  ;;  %p274_p10 = scmp.lt.s32.totalorder (!%p239_p9), %s881_s17, 7  ;;  %vm467_vm0 = vcmask (!%p239_p9), 1045504   ;;  %v323_v62 = vlaneseq (!%p239_p9) }
  0x2f   : > { %242 = sbr.rel (%p239_p9) target bundleno = 304 (0x130), region = 51  ;;  %512 = vmatprep.mubr.bf16.mxu0 (!%p239_p9), %v895_v29  ;;  %553 = vmatprep.mubr.bf16.mxu1 (!%p239_p9), %v895_v29  ;;  %vm463_vm1 = vcmask (!%p239_p9), 883712   ;;  %v896_v1 = vmov (!%p239_p9), 1966171168   ;;  %s699_s23 = sshll.u32 (!%p239_p9), %s877_s16, 2 }
  0x30   : > { %s737_s11 = smul.u32 (!%p239_p9), 224, %s245_s10  ;;  %796 = vset.pattern.permute.xlu0 (!%p239_p9), %v895_v29  ;;  %v324_v63 = vshrl.u32 (!%p239_p9), %v323_v62, 7  ;;  %v569_v2 = vunpack.c.l.s4 (!%p239_p9), %v896_v1  ;;  %p281_p11 = scmp.lt.s32.totalorder (!%p239_p9), %s699_s23, 7  ;;  %vm593_vm2 = vcmp.lt.s32.totalorder (!%p239_p9), %v323_v62, 512 }
  0x31   : > { %320 = vperm.xlu0 (!%p239_p9), %796, %v317_v30  }
  0x32   : > { %s1043_s12 = scalar_lea.vmem (!%p239_p9), [#allocation3], %s737_s11  ;;  %v325_v0 = vsub.s32 (!%p239_p9), 0, %v324_v63  ;;  %v570_v5 = vunpack.c.0.s8 (!%p239_p9), %v569_v2 }
  0x33   : > { %v797_v31 = vld [vmem:[%s1043_s12 + $0x4] ss:$16 sps:$4 sm:$0xff] (!%p239_p9)   ;;  %v799_v32 = vld [vmem:[%s1043_s12 + $0xc] ss:$16 sps:$4 sm:$0xff] (!%p239_p9)   ;;  %v801_v33 = vld [vmem:[%s1043_s12] ss:$16 sps:$4 sm:$0xff] (!%p239_p9)  }
  0x34   : > { %480 = vmatprep.subr.bf16.mxu0 (!%p239_p9), %v797_v31  ;;  %v802_v34 = vld [vmem:[%s1043_s12 + $0x8] ss:$16 sps:$4 sm:$0xff] (!%p239_p9)   ;;  %521 = vmatprep.subr.bf16.mxu1 (!%p239_p9), %v799_v32  ;;  %v803_v35 = vld [vmem:[%s1043_s12 + $0x24] ss:$16 sps:$4 sm:$0xff] (!%p239_p9)   ;;  %v805_v36 = vld [vmem:[%s1043_s12 + $0x2c] ss:$16 sps:$4 sm:$0xff] (!%p239_p9)   ;;  %v573_v12 = vsub.s32 (!%p239_p9), %v570_v5, %v324_v63 }
  0x35   : > { %481 = vmatpush1.bf16.msra.mxu0 (!%p239_p9), %v801_v33  ;;  %522 = vmatpush1.bf16.msra.mxu1 (!%p239_p9), %v802_v34  ;;  %v807_v37 = vld [vmem:[%s1043_s12 + $0x20] ss:$16 sps:$4 sm:$0xff] (!%p239_p9)   ;;  %v808_v38 = vld [vmem:[%s1043_s12 + $0x28] ss:$16 sps:$4 sm:$0xff] (!%p239_p9)   ;;  %v809_v39 = vld [vmem:[%s1043_s12 + $0x44] ss:$16 sps:$4 sm:$0xff] (!%p239_p9)  }
  0x36   : > { %482 = vmatprep.subr.bf16.mxu0 %v803_v35  ;;  %523 = vmatprep.subr.bf16.mxu1 %v805_v36  ;;  %v811_v40 = vld [vmem:[%s1043_s12 + $0x4c] ss:$16 sps:$4 sm:$0xff]   ;;  %v813_v41 = vld [vmem:[%s1043_s12 + $0x40] ss:$16 sps:$4 sm:$0xff]   ;;  %v814_v42 = vld [vmem:[%s1043_s12 + $0x48] ss:$16 sps:$4 sm:$0xff]  }
  0x37   : > { %v815_v43 = vld [vmem:[%s1043_s12 + $0x64] ss:$16 sps:$4 sm:$0xff]   ;;  %v817_v44 = vld [vmem:[%s1043_s12 + $0x6c] ss:$16 sps:$4 sm:$0xff]   ;;  %v819_v45 = vld [vmem:[%s1043_s12 + $0x60] ss:$16 sps:$4 sm:$0xff]  }
  0x38   : > { %v820_v46 = vld [vmem:[%s1043_s12 + $0x68] ss:$16 sps:$4 sm:$0xff]   ;;  %v821_v47 = vld [vmem:[%s1043_s12 + $0x84] ss:$16 sps:$4 sm:$0xff]   ;;  %v823_v48 = vld [vmem:[%s1043_s12 + $0x8c] ss:$16 sps:$4 sm:$0xff]  }
  0x39   : > { %483 = vmatpush1.bf16.msra.mxu0 %v807_v37  ;;  %524 = vmatpush1.bf16.msra.mxu1 %v808_v38  ;;  %v825_v49 = vld [vmem:[%s1043_s12 + $0x80] ss:$16 sps:$4 sm:$0xff]   ;;  %v826_v50 = vld [vmem:[%s1043_s12 + $0x88] ss:$16 sps:$4 sm:$0xff]   ;;  %v827_v51 = vld [vmem:[%s1043_s12 + $0xa4] ss:$16 sps:$4 sm:$0xff]  }
  0x3a   : > { %484 = vmatprep.subr.bf16.mxu0 %v809_v39  ;;  %525 = vmatprep.subr.bf16.mxu1 %v811_v40  ;;  %v829_v52 = vld [vmem:[%s1043_s12 + $0xac] ss:$16 sps:$4 sm:$0xff]   ;;  %v831_v53 = vld [vmem:[%s1043_s12 + $0xa0] ss:$16 sps:$4 sm:$0xff]   ;;  %v832_v54 = vld [vmem:[%s1043_s12 + $0xa8] ss:$16 sps:$4 sm:$0xff]  }
  0x3b   : > { %s1124_s17 = smov (!%p274_p10, %s881_s17), 7  ;;  %v833_v55 = vld [vmem:[%s1043_s12 + $0xc4] ss:$16 sps:$4 sm:$0x3f]   ;;  %s1126_s23 = smov (!%p281_p11, %s699_s23), 7 }
  0x3c   : > { %v835_v56 = vld [vmem:[%s1043_s12 + $0xcc] ss:$16 sps:$4 sm:$0x3f]   ;;  %v837_v57 = vld [vmem:[%s1043_s12 + $0xc0] ss:$16 sps:$4 sm:$0x3f]   ;;  %s276_s22 = scalar_lea.vmem %s1107_s0, %s1124_s17 }
  0x3d   : > { %485 = vmatpush1.bf16.msra.mxu0 %v813_v41  ;;  %526 = vmatpush1.bf16.msra.mxu1 %v814_v42  ;;  %v838_v58 = vld [vmem:[%s1043_s12 + $0xc8] ss:$16 sps:$4 sm:$0x3f]   ;;  %v469_v59 = vsel %vm467_vm0, %v837_v57, 0  ;;  %v288_v61 = vld [vmem:[%s276_s22] sm:$0x1] }
  0x3e   : > { %486 = vmatprep.subr.bf16.mxu0 %v815_v43  ;;  %527 = vmatprep.subr.bf16.mxu1 %v817_v44  ;;  %v475_v60 = vsel %vm467_vm0, %v838_v58, 0  ;;  %s700_s24 = sshll.u32 %s1124_s17, 3 }
  0x3f   : > { %s284_s16 = sadd.s32 %s700_s24, %s1126_s23 }
  0x40   : > { %s285_s28 = scalar_lea.vmem %s1110_s3, %s284_s16 }
  0x41   : > { %487 = vmatpush1.bf16.msra.mxu0 %v819_v45  ;;  %528 = vmatpush1.bf16.msra.mxu1 %v820_v46 }
  0x42   : > { %488 = vmatprep.subr.bf16.mxu0 %v821_v47  ;;  %529 = vmatprep.subr.bf16.mxu1 %v823_v48 }
  0x45   : > { %489 = vmatpush1.bf16.msra.mxu0 %v825_v49  ;;  %530 = vmatpush1.bf16.msra.mxu1 %v826_v50 }
  0x46   : > { %490 = vmatprep.subr.bf16.mxu0 %v827_v51  ;;  %531 = vmatprep.subr.bf16.mxu1 %v829_v52 }
  0x49   : > { %491 = vmatpush1.bf16.msra.mxu0 %v831_v53  ;;  %532 = vmatpush1.bf16.msra.mxu1 %v832_v54 }
  0x4a   : > { %729 = vmatprep.subr.msk.bf16.mxu0 %vm467_vm0, %v833_v55  ;;  %731 = vmatprep.subr.msk.bf16.mxu1 %vm467_vm0, %v835_v56 }
  0x4d   : > { %493 = vmatpush1.bf16.msra.mxu0 %v469_v59  ;;  %534 = vmatpush1.bf16.msra.mxu1 %v475_v60 }
  0x50   : > { %730 = vmatmul.mubr.msk.bf16.vlgmr.msra.gmra.mrb[0].mxu0 %vm463_vm1, %v288_v61  ;;  %732 = vmatmul.mubr.msk.bf16.vlgmr.msra.gmra.mrb[0].mxu1 %vm463_vm1, %v288_v61 }
  0xb0   : > { %v321_v3 = vpop.permute.xlu0 %320 }
  0xb1   : > { %v326_v4 = vrot.slane %v321_v3, %v325_v0 }
 0x123   : > { %v514_v6 = vpop.f32.mrb[0].mxu0  ;;  %v555_v7 = vpop.f32.mrb[0].mxu1 }
 0x124   : > { %v515_v8 = vadd.f32 %v514_v6, %v326_v4  ;;  %v556_v9 = vadd.f32 %v555_v7, %v326_v4  ;;  %v516_v10 = vpop.f32.mrb[1].mxu0  ;;  %v557_v11 = vpop.f32.mrb[1].mxu1 }
 0x125   : > { %v517_v13 = vadd.f32 %v516_v10, %v326_v4  ;;  %v558_v14 = vadd.f32 %v557_v11, %v326_v4  ;;  %v518_v15 = vpop.f32.mrb[2].mxu0  ;;  %v559_v16 = vpop.f32.mrb[2].mxu1 }
 0x126   : > { %v519_v17 = vpop.f32.mrb[3].mxu0  ;;  %v560_v18 = vpop.f32.mrb[3].mxu1 }
 0x127   : > { %v566_v19 = vcombine.low %v515_v8, %v517_v13  ;;  %v567_v20 = vcombine.low %v556_v9, %v558_v14 }
 0x129   : > { %v574_v21 = vrot.slane %v566_v19, %v573_v12  ;;  %v581_v22 = vrot.slane %v567_v20, %v573_v12 }
 0x12b   : > { %v582_v23 = vcombine.low %v574_v21, %v581_v22 }
 0x12d   : > { %v589_v24 = vrot.slane %v582_v23, %v573_v12 }
 0x12f   : > { %595 = vst.msk [vmem:[%s285_s28] sm:$0xf] %vm593_vm2, %v589_v24 }
 0x130 PF: > { %s15_s20 = sadd.s32 1, %s893_s20   ;;  %s1111_s14 = smov %s873_s15 }
 0x131   : > { %p12_p12 = scmp.ge.s32.totalorder %s15_s20, 18   ;;  %s1112_s15 = smov %s971_s26 }
 0x132   : > { %s1113_s16 = smov %s885_s18  ;;  %s1114_s17 = smov %s889_s19 }
 0x133   : > { %s1115_s18 = smov %s1118_s2  ;;  %s1116_s19 = smov %s1122_s21 }
 0x134   :  { %14 = sbr.rel (!%p12_p12) target bundleno = 7 (0x7), region = 93 }

</bundles_post_ra>
